<compile_context>
chip_gen: v7x
topology: tpu7x:2x2x1
jax: 0.10.0
libtpu: 0.0.40
codegen_flags: <defaults>
</compile_context>

<pallas_src>
import math
import functools
import numpy as np

import jax
import jax.numpy as jnp
from jax import lax
from jax.experimental import pallas as pl
from jax.experimental.pallas import tpu as pltpu

# ---------------- small model config (ModelArgs analogue) ----------------
DIM = 64
N_LAYERS = 2
N_HEADS = 4
N_KV_HEADS = 2
VOCAB = 256
MULTIPLE_OF = 32
NORM_EPS = 1e-5
MAX_SEQ_LEN = 16
HEAD_DIM = DIM // N_HEADS            # 16
HALF_HD = HEAD_DIM // 2              # 8
N_REP = N_HEADS // N_KV_HEADS        # 2
_hd = int(2 * (4 * DIM) / 3)
FFN_DIM = MULTIPLE_OF * ((_hd + MULTIPLE_OF - 1) // MULTIPLE_OF)   # 192

Q_WIDTH = N_HEADS * HEAD_DIM         # 64
KV_WIDTH = N_KV_HEADS * HEAD_DIM     # 32
QKV_WIDTH = Q_WIDTH + 2 * KV_WIDTH   # 128


# ---------------- in-kernel helpers (traced, pure VPU/EUP/XLU work) ----------------
def _rmsnorm(x, w, eps):
    ms = jnp.mean(x * x, axis=-1, keepdims=True)
    return (x * lax.rsqrt(ms + eps)) * w


def _apply_rope(x, cos_t, sin_t, n_heads):
    # x: [S, n_heads*HEAD_DIM] with per-head de-interleaved layout [real(8) | imag(8)].
    # Pure VPU math; attention scores are invariant to the (consistent) column perm.
    parts = []
    for h in range(n_heads):
        b = h * HEAD_DIM
        xr = x[:, b:b + HALF_HD]
        xi = x[:, b + HALF_HD:b + HEAD_DIM]
        parts.append(xr * cos_t - xi * sin_t)
        parts.append(xr * sin_t + xi * cos_t)
    return jnp.concatenate(parts, axis=-1)


# ---------------- fused whole-forward kernel: grid = (batch,) ----------------
def _forward_kernel(tok_ref, emb_ref, wqkv_ref, wo_ref, w13_ref, w2_ref,
                    attn_norm_ref, ffn_norm_ref, final_norm_ref,
                    cos_ref, sin_ref, logits_ref, *, scale, eps):
    S = tok_ref.shape[1]
    tok = tok_ref[0]                                  # [S, 1] int32
    emb = emb_ref[...]                                # [VOCAB, DIM]

    # Token embedding gather as exact one-hot @ emb (single MXU push, keeps the
    # whole forward inside one pallas_call).
    vocab_iota = lax.broadcasted_iota(jnp.int32, (S, VOCAB), 1)
    onehot = (vocab_iota == tok).astype(jnp.float32)                 # [S, VOCAB]
    h = jnp.dot(onehot, emb, preferred_element_type=jnp.float32)     # [S, DIM]

    cos_t = cos_ref[...]                              # [S, HALF_HD]
    sin_t = sin_ref[...]

    for l in range(N_LAYERS):                         # unrolled: N_LAYERS = 2
        # -------- attention block --------
        xn = _rmsnorm(h, attn_norm_ref[l], eps)
        # fused QKV projection: lane-dense [S, 128] output, K/V computed once
        qkv = jnp.dot(xn, wqkv_ref[l], preferred_element_type=jnp.float32)
        q = _apply_rope(qkv[:, :Q_WIDTH], cos_t, sin_t, N_HEADS)                 # [S, 64]
        k = _apply_rope(qkv[:, Q_WIDTH:Q_WIDTH + KV_WIDTH], cos_t, sin_t,
                        N_KV_HEADS)                                              # [S, 32]
        v = qkv[:, Q_WIDTH + KV_WIDTH:]                                          # [S, 32]

        head_outs = []
        for hh in range(N_HEADS):                     # unrolled: 4 heads
            g = hh // N_REP                           # repeat_kv via index sharing
            qh = q[:, hh * HEAD_DIM:(hh + 1) * HEAD_DIM]
            kh = k[:, g * HEAD_DIM:(g + 1) * HEAD_DIM]
            vh = v[:, g * HEAD_DIM:(g + 1) * HEAD_DIM]
            s = lax.dot_general(qh, kh, (((1,), (1,)), ((), ())),
                                preferred_element_type=jnp.float32) * scale      # [S, S]
            s = s - jnp.max(s, axis=-1, keepdims=True)
            p = jnp.exp(s)
            p = p * pl.reciprocal(jnp.sum(p, axis=-1, keepdims=True), approx=True)
            head_outs.append(jnp.dot(p, vh, preferred_element_type=jnp.float32))
        att = jnp.concatenate(head_outs, axis=-1)                                # [S, DIM]
        h = h + jnp.dot(att, wo_ref[l], preferred_element_type=jnp.float32)

        # -------- SwiGLU feed-forward block --------
        xn = _rmsnorm(h, ffn_norm_ref[l], eps)
        h13 = jnp.dot(xn, w13_ref[l], preferred_element_type=jnp.float32)        # [S, 2*FFN]
        g1 = h13[:, :FFN_DIM]
        u = h13[:, FFN_DIM:]
        act = (g1 * jax.nn.sigmoid(g1)) * u                                      # silu * gate
        h = h + jnp.dot(act, w2_ref[l], preferred_element_type=jnp.float32)

    hn = _rmsnorm(h, final_norm_ref[...], eps)
    # tied vocab projection hn @ emb.T: contract on axis 1 of both, no transpose materialized
    logits_ref[0] = lax.dot_general(hn, emb, (((1,), (1,)), ((), ())),
                                    preferred_element_type=jnp.float32)          # [S, VOCAB]


def transformer_forward(tokens, prepped, cos_t, sin_t):
    B, S = tokens.shape
    tok3 = tokens.reshape(B, S, 1)
    kernel = functools.partial(_forward_kernel,
                               scale=1.0 / math.sqrt(HEAD_DIM), eps=NORM_EPS)
    return pl.pallas_call(
        kernel,
        grid=(B,),
        in_specs=[
            pl.BlockSpec((1, S, 1), lambda b: (b, 0, 0)),                        # tokens
            pl.BlockSpec((VOCAB, DIM), lambda b: (0, 0)),                        # emb (tied)
            pl.BlockSpec((N_LAYERS, DIM, QKV_WIDTH), lambda b: (0, 0, 0)),       # Wq|Wk|Wv
            pl.BlockSpec((N_LAYERS, DIM, DIM), lambda b: (0, 0, 0)),             # Wo
            pl.BlockSpec((N_LAYERS, DIM, 2 * FFN_DIM), lambda b: (0, 0, 0)),     # W1|W3
            pl.BlockSpec((N_LAYERS, FFN_DIM, DIM), lambda b: (0, 0, 0)),         # W2
            pl.BlockSpec((N_LAYERS, 1, DIM), lambda b: (0, 0, 0)),               # attn norms
            pl.BlockSpec((N_LAYERS, 1, DIM), lambda b: (0, 0, 0)),               # ffn norms
            pl.BlockSpec((1, DIM), lambda b: (0, 0)),                            # final norm
            pl.BlockSpec((S, HALF_HD), lambda b: (0, 0)),                        # cos
            pl.BlockSpec((S, HALF_HD), lambda b: (0, 0)),                        # sin
        ],
        out_specs=pl.BlockSpec((1, S, VOCAB), lambda b: (b, 0, 0)),              # lane-dense (256)
        out_shape=jax.ShapeDtypeStruct((B, S, VOCAB), jnp.float32),
        compiler_params=pltpu.CompilerParams(
            dimension_semantics=("parallel",)),      # v7x: 2 TCs each take half the batch
    )(tok3, prepped["emb"], prepped["wqkv"], prepped["wo"], prepped["w13"],
      prepped["w2"], prepped["attn_norm"], prepped["ffn_norm"],
      prepped["final_norm"], cos_t, sin_t)


# ---------------- parameter init / one-time host-side packing ----------------
def init_params(key):
    std = 0.02
    std_res = 0.02 / math.sqrt(2 * N_LAYERS)   # wo.weight / w3.weight special init
    keys = iter(jax.random.split(key, 1 + N_LAYERS * 7))
    params = {"emb": std * jax.random.normal(next(keys), (VOCAB, DIM), jnp.float32)}
    layers = []
    for _ in range(N_LAYERS):
        layers.append(dict(
            wq=std * jax.random.normal(next(keys), (DIM, N_HEADS * HEAD_DIM), jnp.float32),
            wk=std * jax.random.normal(next(keys), (DIM, N_KV_HEADS * HEAD_DIM), jnp.float32),
            wv=std * jax.random.normal(next(keys), (DIM, N_KV_HEADS * HEAD_DIM), jnp.float32),
            wo=std_res * jax.random.normal(next(keys), (N_HEADS * HEAD_DIM, DIM), jnp.float32),
            w1=std * jax.random.normal(next(keys), (DIM, FFN_DIM), jnp.float32),
            w2=std * jax.random.normal(next(keys), (FFN_DIM, DIM), jnp.float32),
            w3=std_res * jax.random.normal(next(keys), (DIM, FFN_DIM), jnp.float32),
            attn_norm=jnp.ones((DIM,), jnp.float32),
            ffn_norm=jnp.ones((DIM,), jnp.float32),
        ))
    params["layers"] = layers
    params["final_norm"] = jnp.ones((DIM,), jnp.float32)
    return params


def _deinterleave_perm(n_heads):
    # per head: evens (real parts) first, then odds (imag parts)
    perm = []
    for h in range(n_heads):
        base = h * HEAD_DIM
        perm += [base + 2 * j for j in range(HALF_HD)]
        perm += [base + 2 * j + 1 for j in range(HALF_HD)]
    return np.asarray(perm, dtype=np.int32)


def prepare_params(params):
    """One-time weight packing (QKV fuse, W1|W3 fuse, RoPE column de-interleave),
    hoisted out of the per-call forward."""
    perm_q = _deinterleave_perm(N_HEADS)
    perm_k = _deinterleave_perm(N_KV_HEADS)
    wqkv, wo, w13, w2, an, fn = [], [], [], [], [], []
    for lyr in params["layers"]:
        wq_p = lyr["wq"][:, perm_q]
        wk_p = lyr["wk"][:, perm_k]
        wqkv.append(jnp.concatenate([wq_p, wk_p, lyr["wv"]], axis=1))   # [D, 128]
        wo.append(lyr["wo"])                                            # [D, D]
        w13.append(jnp.concatenate([lyr["w1"], lyr["w3"]], axis=1))     # [D, 2*FFN]
        w2.append(lyr["w2"])                                            # [FFN, D]
        an.append(lyr["attn_norm"].reshape(1, DIM))
        fn.append(lyr["ffn_norm"].reshape(1, DIM))
    return dict(
        emb=params["emb"],
        wqkv=jnp.stack(wqkv),
        wo=jnp.stack(wo),
        w13=jnp.stack(w13),
        w2=jnp.stack(w2),
        attn_norm=jnp.stack(an),
        ffn_norm=jnp.stack(fn),
        final_norm=params["final_norm"].reshape(1, DIM),
    )


def precompute_rope(head_dim, end, theta=10000.0):
    freqs = 1.0 / (theta ** (np.arange(0, head_dim, 2)[: head_dim // 2].astype(np.float32) / head_dim))
    t = np.arange(end, dtype=np.float32)
    f = np.outer(t, freqs).astype(np.float32)
    return jnp.asarray(np.cos(f)), jnp.asarray(np.sin(f))      # [end, hd/2] each


# ---------------- pure-JAX reference (for correctness check) ----------------
def _ref_rmsnorm(x, w, eps=NORM_EPS):
    ms = jnp.mean(x * x, axis=-1, keepdims=True)
    return x * lax.rsqrt(ms + eps) * w


def ref_forward(tokens, params, cos_h, sin_h):
    hp = lax.Precision.HIGHEST
    B, S = tokens.shape
    h = params["emb"][tokens]

    def rope(x):
        xr = x.reshape(x.shape[:-1] + (HEAD_DIM // 2, 2))
        xre, xim = xr[..., 0], xr[..., 1]
        c = cos_h[:S][None, :, None, :]
        s = sin_h[:S][None, :, None, :]
        return jnp.stack([xre * c - xim * s, xre * s + xim * c], axis=-1).reshape(x.shape)

    for lyr in params["layers"]:
        xn = _ref_rmsnorm(h, lyr["attn_norm"])
        q = jnp.einsum("bsd,de->bse", xn, lyr["wq"], precision=hp).reshape(B, S, N_HEADS, HEAD_DIM)
        k = jnp.einsum("bsd,de->bse", xn, lyr["wk"], precision=hp).reshape(B, S, N_KV_HEADS, HEAD_DIM)
        v = jnp.einsum("bsd,de->bse", xn, lyr["wv"], precision=hp).reshape(B, S, N_KV_HEADS, HEAD_DIM)
        q, k = rope(q), rope(k)
        k = jnp.repeat(k, N_REP, axis=2)
        v = jnp.repeat(v, N_REP, axis=2)
        q, k, v = (t.transpose(0, 2, 1, 3) for t in (q, k, v))
        s = jnp.einsum("bhqd,bhkd->bhqk", q, k, precision=hp) / math.sqrt(HEAD_DIM)
        p = jax.nn.softmax(s, axis=-1)
        o = jnp.einsum("bhqk,bhkd->bhqd", p, v, precision=hp)
        o = o.transpose(0, 2, 1, 3).reshape(B, S, DIM)
        h = h + jnp.einsum("bsd,de->bse", o, lyr["wo"], precision=hp)
        xn = _ref_rmsnorm(h, lyr["ffn_norm"])
        g = jnp.einsum("bsd,de->bse", xn, lyr["w1"], precision=hp)
        g = g * jax.nn.sigmoid(g)
        u = jnp.einsum("bsd,de->bse", xn, lyr["w3"], precision=hp)
        h = h + jnp.einsum("bse,ed->bsd", g * u, lyr["w2"], precision=hp)
    hn = _ref_rmsnorm(h, params["final_norm"])
    return jnp.einsum("bsd,vd->bsv", hn, params["emb"], precision=hp)


if __name__ == "__main__":
    key = jax.random.PRNGKey(0)
    pkey, tkey = jax.random.split(key)
    params = init_params(pkey)
    prepped = prepare_params(params)          # one-time layout packing, outside the forward
    cos_h, sin_h = precompute_rope(HEAD_DIM, MAX_SEQ_LEN)

    B, S = 2, 8
    tokens = jax.random.randint(tkey, (B, S), 0, VOCAB, dtype=jnp.int32)

    # TODO(synk): training loss (masked cross-entropy) and generate() sampling are not
    # kernelized; this implements the forward logits path only (targets=None).
    fwd = jax.jit(transformer_forward)
    logits = jax.block_until_ready(fwd(tokens, prepped, cos_h[:S], sin_h[:S]))

    assert logits.shape == (B, S, VOCAB)
    assert np.isfinite(np.asarray(logits)).all()

    ref = jax.block_until_ready(ref_forward(tokens, params, cos_h, sin_h))
    max_err = float(jnp.max(jnp.abs(logits - ref)))
    if max_err < 2e-2:
        print("KERNEL_OK")
    else:
        print(f"MISMATCH max_abs_err={max_err}")
</pallas_src>

<mosaic_0001>
module attributes {stable_mosaic.version = 11 : i64} {
  func.func @_forward_kernel(%arg0: i32, %arg1: memref<1x8x1xi32, #tpu.memory_space<vmem>>, %arg2: memref<256x64xf32, #tpu.memory_space<vmem>>, %arg3: memref<2x64x128xf32, #tpu.memory_space<vmem>>, %arg4: memref<2x64x64xf32, #tpu.memory_space<vmem>>, %arg5: memref<2x64x384xf32, #tpu.memory_space<vmem>>, %arg6: memref<2x192x64xf32, #tpu.memory_space<vmem>>, %arg7: memref<2x1x64xf32, #tpu.memory_space<vmem>>, %arg8: memref<2x1x64xf32, #tpu.memory_space<vmem>>, %arg9: memref<1x64xf32, #tpu.memory_space<vmem>>, %arg10: memref<8x8xf32, #tpu.memory_space<vmem>>, %arg11: memref<8x8xf32, #tpu.memory_space<vmem>>, %arg12: memref<1x8x256xf32, #tpu.memory_space<vmem>>) attributes {dimension_semantics = [#tpu.dimension_semantics<parallel>], iteration_bounds = array<i64: 2>, scalar_prefetch = 0 : i64, scratch_operands = 0 : i64, tpu.core_type = #tpu.core_type<tc>, window_params = [{transform_indices = @transform_0, window_bounds = array<i64: 1, 8, 1>}, {pipeline_mode = #tpu.pipeline_mode<synchronous>, transform_indices = @transform_1, window_bounds = array<i64: 256, 64>}, {pipeline_mode = #tpu.pipeline_mode<synchronous>, transform_indices = @transform_2, window_bounds = array<i64: 2, 64, 128>}, {pipeline_mode = #tpu.pipeline_mode<synchronous>, transform_indices = @transform_3, window_bounds = array<i64: 2, 64, 64>}, {pipeline_mode = #tpu.pipeline_mode<synchronous>, transform_indices = @transform_4, window_bounds = array<i64: 2, 64, 384>}, {pipeline_mode = #tpu.pipeline_mode<synchronous>, transform_indices = @transform_5, window_bounds = array<i64: 2, 192, 64>}, {pipeline_mode = #tpu.pipeline_mode<synchronous>, transform_indices = @transform_6, window_bounds = array<i64: 2, 1, 64>}, {pipeline_mode = #tpu.pipeline_mode<synchronous>, transform_indices = @transform_7, window_bounds = array<i64: 2, 1, 64>}, {pipeline_mode = #tpu.pipeline_mode<synchronous>, transform_indices = @transform_8, window_bounds = array<i64: 1, 64>}, {pipeline_mode = #tpu.pipeline_mode<synchronous>, transform_indices = @transform_9, window_bounds = array<i64: 8, 8>}, {pipeline_mode = #tpu.pipeline_mode<synchronous>, transform_indices = @transform_10, window_bounds = array<i64: 8, 8>}, {transform_indices = @transform_11, window_bounds = array<i64: 1, 8, 256>}]} {
    %c0 = arith.constant 0 : index
    %c0_0 = arith.constant 0 : index
    %c0_1 = arith.constant 0 : index
    %0 = vector.load %arg1[%c0, %c0_0, %c0_1] : memref<1x8x1xi32, #tpu.memory_space<vmem>>, vector<1x8x1xi32>
    %1 = vector.shape_cast %0 : vector<1x8x1xi32> to vector<8x1xi32>
    %c0_2 = arith.constant 0 : index
    %c0_3 = arith.constant 0 : index
    %2 = vector.load %arg2[%c0_2, %c0_3] : memref<256x64xf32, #tpu.memory_space<vmem>>, vector<256x64xf32>
    %3 = tpu.iota {dimensions = array<i32: 1>} : vector<8x256xi32>
    %4 = vector.broadcast %1 : vector<8x1xi32> to vector<8x256xi32>
    %5 = arith.cmpi eq, %3, %4 : vector<8x256xi32>
    %6 = arith.extui %5 : vector<8x256xi1> to vector<8x256xi32>
    %7 = arith.sitofp %6 : vector<8x256xi32> to vector<8x256xf32>
    %cst = arith.constant dense<0.000000e+00> : vector<8x64xf32>
    %8 = tpu.matmul %7, %2, %cst {dimension_numbers = #tpu.dot_dimension_numbers<[1], [0], [0], [1], [0, 0, 1, 1], [], []>} : vector<8x256xf32>, vector<256x64xf32>, vector<8x64xf32> -> vector<8x64xf32>
    %c0_4 = arith.constant 0 : index
    %c0_5 = arith.constant 0 : index
    %9 = vector.load %arg10[%c0_4, %c0_5] : memref<8x8xf32, #tpu.memory_space<vmem>>, vector<8x8xf32>
    %c0_6 = arith.constant 0 : index
    %c0_7 = arith.constant 0 : index
    %10 = vector.load %arg11[%c0_6, %c0_7] : memref<8x8xf32, #tpu.memory_space<vmem>>, vector<8x8xf32>
    %c0_8 = arith.constant 0 : index
    %c0_9 = arith.constant 0 : index
    %c0_10 = arith.constant 0 : index
    %11 = vector.load %arg7[%c0_8, %c0_9, %c0_10] : memref<2x1x64xf32, #tpu.memory_space<vmem>>, vector<1x1x64xf32>
    %12 = vector.shape_cast %11 : vector<1x1x64xf32> to vector<1x64xf32>
    %13 = arith.mulf %8, %8 : vector<8x64xf32>
    %cst_11 = arith.constant dense<0.000000e+00> : vector<8xf32>
    %14 = vector.multi_reduction <add>, %13, %cst_11 [1] : vector<8x64xf32> to vector<8xf32>
    %15 = vector.shape_cast %14 : vector<8xf32> to vector<8x1xf32>
    %cst_12 = arith.constant 6.400000e+01 : f32
    %16 = vector.broadcast %cst_12 : f32 to vector<8x1xf32>
    %17 = arith.divf %15, %16 : vector<8x1xf32>
    %cst_13 = arith.constant 9.99999974E-6 : f32
    %18 = vector.broadcast %cst_13 : f32 to vector<8x1xf32>
    %19 = arith.addf %17, %18 : vector<8x1xf32>
    %20 = math.rsqrt %19 : vector<8x1xf32>
    %21 = vector.broadcast %20 : vector<8x1xf32> to vector<8x64xf32>
    %22 = arith.mulf %8, %21 : vector<8x64xf32>
    %23 = vector.broadcast %12 : vector<1x64xf32> to vector<8x64xf32>
    %24 = arith.mulf %22, %23 : vector<8x64xf32>
    %c0_14 = arith.constant 0 : index
    %c0_15 = arith.constant 0 : index
    %c0_16 = arith.constant 0 : index
    %25 = vector.load %arg3[%c0_14, %c0_15, %c0_16] : memref<2x64x128xf32, #tpu.memory_space<vmem>>, vector<1x64x128xf32>
    %26 = vector.shape_cast %25 : vector<1x64x128xf32> to vector<64x128xf32>
    %cst_17 = arith.constant dense<0.000000e+00> : vector<8x128xf32>
    %27 = tpu.matmul %24, %26, %cst_17 {dimension_numbers = #tpu.dot_dimension_numbers<[1], [0], [0], [1], [0, 0, 1, 1], [], []>} : vector<8x64xf32>, vector<64x128xf32>, vector<8x128xf32> -> vector<8x128xf32>
    %28 = vector.extract_strided_slice %27 {offsets = [0, 0], sizes = [8, 64], strides = [1, 1]} : vector<8x128xf32> to vector<8x64xf32>
    %29 = vector.extract_strided_slice %28 {offsets = [0, 0], sizes = [8, 8], strides = [1, 1]} : vector<8x64xf32> to vector<8x8xf32>
    %30 = vector.extract_strided_slice %28 {offsets = [0, 8], sizes = [8, 8], strides = [1, 1]} : vector<8x64xf32> to vector<8x8xf32>
    %31 = arith.mulf %29, %9 : vector<8x8xf32>
    %32 = arith.mulf %30, %10 : vector<8x8xf32>
    %33 = arith.subf %31, %32 : vector<8x8xf32>
    %34 = arith.mulf %29, %10 : vector<8x8xf32>
    %35 = arith.mulf %30, %9 : vector<8x8xf32>
    %36 = arith.addf %34, %35 : vector<8x8xf32>
    %37 = vector.extract_strided_slice %28 {offsets = [0, 16], sizes = [8, 8], strides = [1, 1]} : vector<8x64xf32> to vector<8x8xf32>
    %38 = vector.extract_strided_slice %28 {offsets = [0, 24], sizes = [8, 8], strides = [1, 1]} : vector<8x64xf32> to vector<8x8xf32>
    %39 = arith.mulf %37, %9 : vector<8x8xf32>
    %40 = arith.mulf %38, %10 : vector<8x8xf32>
    %41 = arith.subf %39, %40 : vector<8x8xf32>
    %42 = arith.mulf %37, %10 : vector<8x8xf32>
    %43 = arith.mulf %38, %9 : vector<8x8xf32>
    %44 = arith.addf %42, %43 : vector<8x8xf32>
    %45 = vector.extract_strided_slice %28 {offsets = [0, 32], sizes = [8, 8], strides = [1, 1]} : vector<8x64xf32> to vector<8x8xf32>
    %46 = vector.extract_strided_slice %28 {offsets = [0, 40], sizes = [8, 8], strides = [1, 1]} : vector<8x64xf32> to vector<8x8xf32>
    %47 = arith.mulf %45, %9 : vector<8x8xf32>
    %48 = arith.mulf %46, %10 : vector<8x8xf32>
    %49 = arith.subf %47, %48 : vector<8x8xf32>
    %50 = arith.mulf %45, %10 : vector<8x8xf32>
    %51 = arith.mulf %46, %9 : vector<8x8xf32>
    %52 = arith.addf %50, %51 : vector<8x8xf32>
    %53 = vector.extract_strided_slice %28 {offsets = [0, 48], sizes = [8, 8], strides = [1, 1]} : vector<8x64xf32> to vector<8x8xf32>
    %54 = vector.extract_strided_slice %28 {offsets = [0, 56], sizes = [8, 8], strides = [1, 1]} : vector<8x64xf32> to vector<8x8xf32>
    %55 = arith.mulf %53, %9 : vector<8x8xf32>
    %56 = arith.mulf %54, %10 : vector<8x8xf32>
    %57 = arith.subf %55, %56 : vector<8x8xf32>
    %58 = arith.mulf %53, %10 : vector<8x8xf32>
    %59 = arith.mulf %54, %9 : vector<8x8xf32>
    %60 = arith.addf %58, %59 : vector<8x8xf32>
    %61 = tpu.concatenate %33, %36, %41, %44, %49, %52, %57, %60 in 1 : vector<8x8xf32>, vector<8x8xf32>, vector<8x8xf32>, vector<8x8xf32>, vector<8x8xf32>, vector<8x8xf32>, vector<8x8xf32>, vector<8x8xf32> -> vector<8x64xf32>
    %62 = vector.extract_strided_slice %27 {offsets = [0, 64], sizes = [8, 32], strides = [1, 1]} : vector<8x128xf32> to vector<8x32xf32>
    %63 = vector.extract_strided_slice %62 {offsets = [0, 0], sizes = [8, 8], strides = [1, 1]} : vector<8x32xf32> to vector<8x8xf32>
    %64 = vector.extract_strided_slice %62 {offsets = [0, 8], sizes = [8, 8], strides = [1, 1]} : vector<8x32xf32> to vector<8x8xf32>
    %65 = arith.mulf %63, %9 : vector<8x8xf32>
    %66 = arith.mulf %64, %10 : vector<8x8xf32>
    %67 = arith.subf %65, %66 : vector<8x8xf32>
    %68 = arith.mulf %63, %10 : vector<8x8xf32>
    %69 = arith.mulf %64, %9 : vector<8x8xf32>
    %70 = arith.addf %68, %69 : vector<8x8xf32>
    %71 = vector.extract_strided_slice %62 {offsets = [0, 16], sizes = [8, 8], strides = [1, 1]} : vector<8x32xf32> to vector<8x8xf32>
    %72 = vector.extract_strided_slice %62 {offsets = [0, 24], sizes = [8, 8], strides = [1, 1]} : vector<8x32xf32> to vector<8x8xf32>
    %73 = arith.mulf %71, %9 : vector<8x8xf32>
    %74 = arith.mulf %72, %10 : vector<8x8xf32>
    %75 = arith.subf %73, %74 : vector<8x8xf32>
    %76 = arith.mulf %71, %10 : vector<8x8xf32>
    %77 = arith.mulf %72, %9 : vector<8x8xf32>
    %78 = arith.addf %76, %77 : vector<8x8xf32>
    %79 = tpu.concatenate %67, %70, %75, %78 in 1 : vector<8x8xf32>, vector<8x8xf32>, vector<8x8xf32>, vector<8x8xf32> -> vector<8x32xf32>
    %80 = vector.extract_strided_slice %27 {offsets = [0, 96], sizes = [8, 32], strides = [1, 1]} : vector<8x128xf32> to vector<8x32xf32>
    %81 = vector.extract_strided_slice %61 {offsets = [0, 0], sizes = [8, 16], strides = [1, 1]} : vector<8x64xf32> to vector<8x16xf32>
    %82 = vector.extract_strided_slice %79 {offsets = [0, 0], sizes = [8, 16], strides = [1, 1]} : vector<8x32xf32> to vector<8x16xf32>
    %83 = vector.extract_strided_slice %80 {offsets = [0, 0], sizes = [8, 16], strides = [1, 1]} : vector<8x32xf32> to vector<8x16xf32>
    %cst_18 = arith.constant dense<0.000000e+00> : vector<8x8xf32>
    %84 = tpu.matmul %81, %82, %cst_18 {dimension_numbers = #tpu.dot_dimension_numbers<[1], [1], [0], [0], [0, 0, 1, 0], [], []>} : vector<8x16xf32>, vector<8x16xf32>, vector<8x8xf32> -> vector<8x8xf32>
    %cst_19 = arith.constant 2.500000e-01 : f32
    %85 = vector.broadcast %cst_19 : f32 to vector<8x8xf32>
    %86 = arith.mulf %84, %85 : vector<8x8xf32>
    %cst_20 = arith.constant dense<0xFF800000> : vector<8xf32>
    %87 = vector.multi_reduction <maximumf>, %86, %cst_20 [1] : vector<8x8xf32> to vector<8xf32>
    %88 = vector.shape_cast %87 : vector<8xf32> to vector<8x1xf32>
    %89 = vector.broadcast %88 : vector<8x1xf32> to vector<8x8xf32>
    %90 = arith.subf %86, %89 : vector<8x8xf32>
    %91 = math.exp %90 : vector<8x8xf32>
    %cst_21 = arith.constant dense<0.000000e+00> : vector<8xf32>
    %92 = vector.multi_reduction <add>, %91, %cst_21 [1] : vector<8x8xf32> to vector<8xf32>
    %93 = vector.shape_cast %92 : vector<8xf32> to vector<8x1xf32>
    %94 = tpu.reciprocal %93 {approx = true} : vector<8x1xf32> -> vector<8x1xf32>
    %95 = vector.broadcast %94 : vector<8x1xf32> to vector<8x8xf32>
    %96 = arith.mulf %91, %95 : vector<8x8xf32>
    %cst_22 = arith.constant dense<0.000000e+00> : vector<8x16xf32>
    %97 = tpu.matmul %96, %83, %cst_22 {dimension_numbers = #tpu.dot_dimension_numbers<[1], [0], [0], [1], [0, 0, 1, 1], [], []>} : vector<8x8xf32>, vector<8x16xf32>, vector<8x16xf32> -> vector<8x16xf32>
    %98 = vector.extract_strided_slice %61 {offsets = [0, 16], sizes = [8, 16], strides = [1, 1]} : vector<8x64xf32> to vector<8x16xf32>
    %99 = vector.extract_strided_slice %79 {offsets = [0, 0], sizes = [8, 16], strides = [1, 1]} : vector<8x32xf32> to vector<8x16xf32>
    %100 = vector.extract_strided_slice %80 {offsets = [0, 0], sizes = [8, 16], strides = [1, 1]} : vector<8x32xf32> to vector<8x16xf32>
    %cst_23 = arith.constant dense<0.000000e+00> : vector<8x8xf32>
    %101 = tpu.matmul %98, %99, %cst_23 {dimension_numbers = #tpu.dot_dimension_numbers<[1], [1], [0], [0], [0, 0, 1, 0], [], []>} : vector<8x16xf32>, vector<8x16xf32>, vector<8x8xf32> -> vector<8x8xf32>
    %cst_24 = arith.constant 2.500000e-01 : f32
    %102 = vector.broadcast %cst_24 : f32 to vector<8x8xf32>
    %103 = arith.mulf %101, %102 : vector<8x8xf32>
    %cst_25 = arith.constant dense<0xFF800000> : vector<8xf32>
    %104 = vector.multi_reduction <maximumf>, %103, %cst_25 [1] : vector<8x8xf32> to vector<8xf32>
    %105 = vector.shape_cast %104 : vector<8xf32> to vector<8x1xf32>
    %106 = vector.broadcast %105 : vector<8x1xf32> to vector<8x8xf32>
    %107 = arith.subf %103, %106 : vector<8x8xf32>
    %108 = math.exp %107 : vector<8x8xf32>
    %cst_26 = arith.constant dense<0.000000e+00> : vector<8xf32>
    %109 = vector.multi_reduction <add>, %108, %cst_26 [1] : vector<8x8xf32> to vector<8xf32>
    %110 = vector.shape_cast %109 : vector<8xf32> to vector<8x1xf32>
    %111 = tpu.reciprocal %110 {approx = true} : vector<8x1xf32> -> vector<8x1xf32>
    %112 = vector.broadcast %111 : vector<8x1xf32> to vector<8x8xf32>
    %113 = arith.mulf %108, %112 : vector<8x8xf32>
    %cst_27 = arith.constant dense<0.000000e+00> : vector<8x16xf32>
    %114 = tpu.matmul %113, %100, %cst_27 {dimension_numbers = #tpu.dot_dimension_numbers<[1], [0], [0], [1], [0, 0, 1, 1], [], []>} : vector<8x8xf32>, vector<8x16xf32>, vector<8x16xf32> -> vector<8x16xf32>
    %115 = vector.extract_strided_slice %61 {offsets = [0, 32], sizes = [8, 16], strides = [1, 1]} : vector<8x64xf32> to vector<8x16xf32>
    %116 = vector.extract_strided_slice %79 {offsets = [0, 16], sizes = [8, 16], strides = [1, 1]} : vector<8x32xf32> to vector<8x16xf32>
    %117 = vector.extract_strided_slice %80 {offsets = [0, 16], sizes = [8, 16], strides = [1, 1]} : vector<8x32xf32> to vector<8x16xf32>
    %cst_28 = arith.constant dense<0.000000e+00> : vector<8x8xf32>
    %118 = tpu.matmul %115, %116, %cst_28 {dimension_numbers = #tpu.dot_dimension_numbers<[1], [1], [0], [0], [0, 0, 1, 0], [], []>} : vector<8x16xf32>, vector<8x16xf32>, vector<8x8xf32> -> vector<8x8xf32>
    %cst_29 = arith.constant 2.500000e-01 : f32
    %119 = vector.broadcast %cst_29 : f32 to vector<8x8xf32>
    %120 = arith.mulf %118, %119 : vector<8x8xf32>
    %cst_30 = arith.constant dense<0xFF800000> : vector<8xf32>
    %121 = vector.multi_reduction <maximumf>, %120, %cst_30 [1] : vector<8x8xf32> to vector<8xf32>
    %122 = vector.shape_cast %121 : vector<8xf32> to vector<8x1xf32>
    %123 = vector.broadcast %122 : vector<8x1xf32> to vector<8x8xf32>
    %124 = arith.subf %120, %123 : vector<8x8xf32>
    %125 = math.exp %124 : vector<8x8xf32>
    %cst_31 = arith.constant dense<0.000000e+00> : vector<8xf32>
    %126 = vector.multi_reduction <add>, %125, %cst_31 [1] : vector<8x8xf32> to vector<8xf32>
    %127 = vector.shape_cast %126 : vector<8xf32> to vector<8x1xf32>
    %128 = tpu.reciprocal %127 {approx = true} : vector<8x1xf32> -> vector<8x1xf32>
    %129 = vector.broadcast %128 : vector<8x1xf32> to vector<8x8xf32>
    %130 = arith.mulf %125, %129 : vector<8x8xf32>
    %cst_32 = arith.constant dense<0.000000e+00> : vector<8x16xf32>
    %131 = tpu.matmul %130, %117, %cst_32 {dimension_numbers = #tpu.dot_dimension_numbers<[1], [0], [0], [1], [0, 0, 1, 1], [], []>} : vector<8x8xf32>, vector<8x16xf32>, vector<8x16xf32> -> vector<8x16xf32>
    %132 = vector.extract_strided_slice %61 {offsets = [0, 48], sizes = [8, 16], strides = [1, 1]} : vector<8x64xf32> to vector<8x16xf32>
    %133 = vector.extract_strided_slice %79 {offsets = [0, 16], sizes = [8, 16], strides = [1, 1]} : vector<8x32xf32> to vector<8x16xf32>
    %134 = vector.extract_strided_slice %80 {offsets = [0, 16], sizes = [8, 16], strides = [1, 1]} : vector<8x32xf32> to vector<8x16xf32>
    %cst_33 = arith.constant dense<0.000000e+00> : vector<8x8xf32>
    %135 = tpu.matmul %132, %133, %cst_33 {dimension_numbers = #tpu.dot_dimension_numbers<[1], [1], [0], [0], [0, 0, 1, 0], [], []>} : vector<8x16xf32>, vector<8x16xf32>, vector<8x8xf32> -> vector<8x8xf32>
    %cst_34 = arith.constant 2.500000e-01 : f32
    %136 = vector.broadcast %cst_34 : f32 to vector<8x8xf32>
    %137 = arith.mulf %135, %136 : vector<8x8xf32>
    %cst_35 = arith.constant dense<0xFF800000> : vector<8xf32>
    %138 = vector.multi_reduction <maximumf>, %137, %cst_35 [1] : vector<8x8xf32> to vector<8xf32>
    %139 = vector.shape_cast %138 : vector<8xf32> to vector<8x1xf32>
    %140 = vector.broadcast %139 : vector<8x1xf32> to vector<8x8xf32>
    %141 = arith.subf %137, %140 : vector<8x8xf32>
    %142 = math.exp %141 : vector<8x8xf32>
    %cst_36 = arith.constant dense<0.000000e+00> : vector<8xf32>
    %143 = vector.multi_reduction <add>, %142, %cst_36 [1] : vector<8x8xf32> to vector<8xf32>
    %144 = vector.shape_cast %143 : vector<8xf32> to vector<8x1xf32>
    %145 = tpu.reciprocal %144 {approx = true} : vector<8x1xf32> -> vector<8x1xf32>
    %146 = vector.broadcast %145 : vector<8x1xf32> to vector<8x8xf32>
    %147 = arith.mulf %142, %146 : vector<8x8xf32>
    %cst_37 = arith.constant dense<0.000000e+00> : vector<8x16xf32>
    %148 = tpu.matmul %147, %134, %cst_37 {dimension_numbers = #tpu.dot_dimension_numbers<[1], [0], [0], [1], [0, 0, 1, 1], [], []>} : vector<8x8xf32>, vector<8x16xf32>, vector<8x16xf32> -> vector<8x16xf32>
    %149 = tpu.concatenate %97, %114, %131, %148 in 1 : vector<8x16xf32>, vector<8x16xf32>, vector<8x16xf32>, vector<8x16xf32> -> vector<8x64xf32>
    %c0_38 = arith.constant 0 : index
    %c0_39 = arith.constant 0 : index
    %c0_40 = arith.constant 0 : index
    %150 = vector.load %arg4[%c0_38, %c0_39, %c0_40] : memref<2x64x64xf32, #tpu.memory_space<vmem>>, vector<1x64x64xf32>
    %151 = vector.shape_cast %150 : vector<1x64x64xf32> to vector<64x64xf32>
    %cst_41 = arith.constant dense<0.000000e+00> : vector<8x64xf32>
    %152 = tpu.matmul %149, %151, %cst_41 {dimension_numbers = #tpu.dot_dimension_numbers<[1], [0], [0], [1], [0, 0, 1, 1], [], []>} : vector<8x64xf32>, vector<64x64xf32>, vector<8x64xf32> -> vector<8x64xf32>
    %153 = arith.addf %8, %152 : vector<8x64xf32>
    %c0_42 = arith.constant 0 : index
    %c0_43 = arith.constant 0 : index
    %c0_44 = arith.constant 0 : index
    %154 = vector.load %arg8[%c0_42, %c0_43, %c0_44] : memref<2x1x64xf32, #tpu.memory_space<vmem>>, vector<1x1x64xf32>
    %155 = vector.shape_cast %154 : vector<1x1x64xf32> to vector<1x64xf32>
    %156 = arith.mulf %153, %153 : vector<8x64xf32>
    %cst_45 = arith.constant dense<0.000000e+00> : vector<8xf32>
    %157 = vector.multi_reduction <add>, %156, %cst_45 [1] : vector<8x64xf32> to vector<8xf32>
    %158 = vector.shape_cast %157 : vector<8xf32> to vector<8x1xf32>
    %cst_46 = arith.constant 6.400000e+01 : f32
    %159 = vector.broadcast %cst_46 : f32 to vector<8x1xf32>
    %160 = arith.divf %158, %159 : vector<8x1xf32>
    %cst_47 = arith.constant 9.99999974E-6 : f32
    %161 = vector.broadcast %cst_47 : f32 to vector<8x1xf32>
    %162 = arith.addf %160, %161 : vector<8x1xf32>
    %163 = math.rsqrt %162 : vector<8x1xf32>
    %164 = vector.broadcast %163 : vector<8x1xf32> to vector<8x64xf32>
    %165 = arith.mulf %153, %164 : vector<8x64xf32>
    %166 = vector.broadcast %155 : vector<1x64xf32> to vector<8x64xf32>
    %167 = arith.mulf %165, %166 : vector<8x64xf32>
    %c0_48 = arith.constant 0 : index
    %c0_49 = arith.constant 0 : index
    %c0_50 = arith.constant 0 : index
    %168 = vector.load %arg5[%c0_48, %c0_49, %c0_50] : memref<2x64x384xf32, #tpu.memory_space<vmem>>, vector<1x64x384xf32>
    %169 = vector.shape_cast %168 : vector<1x64x384xf32> to vector<64x384xf32>
    %cst_51 = arith.constant dense<0.000000e+00> : vector<8x384xf32>
    %170 = tpu.matmul %167, %169, %cst_51 {dimension_numbers = #tpu.dot_dimension_numbers<[1], [0], [0], [1], [0, 0, 1, 1], [], []>} : vector<8x64xf32>, vector<64x384xf32>, vector<8x384xf32> -> vector<8x384xf32>
    %171 = vector.extract_strided_slice %170 {offsets = [0, 0], sizes = [8, 192], strides = [1, 1]} : vector<8x384xf32> to vector<8x192xf32>
    %172 = vector.extract_strided_slice %170 {offsets = [0, 192], sizes = [8, 192], strides = [1, 1]} : vector<8x384xf32> to vector<8x192xf32>
    %173 = arith.negf %171 : vector<8x192xf32>
    %174 = math.exp %173 : vector<8x192xf32>
    %cst_52 = arith.constant 1.000000e+00 : f32
    %175 = vector.broadcast %cst_52 : f32 to vector<8x192xf32>
    %176 = arith.addf %175, %174 : vector<8x192xf32>
    %177 = arith.divf %175, %176 : vector<8x192xf32>
    %178 = arith.mulf %171, %177 : vector<8x192xf32>
    %179 = arith.mulf %178, %172 : vector<8x192xf32>
    %c0_53 = arith.constant 0 : index
    %c0_54 = arith.constant 0 : index
    %c0_55 = arith.constant 0 : index
    %180 = vector.load %arg6[%c0_53, %c0_54, %c0_55] : memref<2x192x64xf32, #tpu.memory_space<vmem>>, vector<1x192x64xf32>
    %181 = vector.shape_cast %180 : vector<1x192x64xf32> to vector<192x64xf32>
    %cst_56 = arith.constant dense<0.000000e+00> : vector<8x64xf32>
    %182 = tpu.matmul %179, %181, %cst_56 {dimension_numbers = #tpu.dot_dimension_numbers<[1], [0], [0], [1], [0, 0, 1, 1], [], []>} : vector<8x192xf32>, vector<192x64xf32>, vector<8x64xf32> -> vector<8x64xf32>
    %183 = arith.addf %153, %182 : vector<8x64xf32>
    %c1 = arith.constant 1 : index
    %c0_57 = arith.constant 0 : index
    %c0_58 = arith.constant 0 : index
    %184 = vector.load %arg7[%c1, %c0_57, %c0_58] : memref<2x1x64xf32, #tpu.memory_space<vmem>>, vector<1x1x64xf32>
    %185 = vector.shape_cast %184 : vector<1x1x64xf32> to vector<1x64xf32>
    %186 = arith.mulf %183, %183 : vector<8x64xf32>
    %cst_59 = arith.constant dense<0.000000e+00> : vector<8xf32>
    %187 = vector.multi_reduction <add>, %186, %cst_59 [1] : vector<8x64xf32> to vector<8xf32>
    %188 = vector.shape_cast %187 : vector<8xf32> to vector<8x1xf32>
    %cst_60 = arith.constant 6.400000e+01 : f32
    %189 = vector.broadcast %cst_60 : f32 to vector<8x1xf32>
    %190 = arith.divf %188, %189 : vector<8x1xf32>
    %cst_61 = arith.constant 9.99999974E-6 : f32
    %191 = vector.broadcast %cst_61 : f32 to vector<8x1xf32>
    %192 = arith.addf %190, %191 : vector<8x1xf32>
    %193 = math.rsqrt %192 : vector<8x1xf32>
    %194 = vector.broadcast %193 : vector<8x1xf32> to vector<8x64xf32>
    %195 = arith.mulf %183, %194 : vector<8x64xf32>
    %196 = vector.broadcast %185 : vector<1x64xf32> to vector<8x64xf32>
    %197 = arith.mulf %195, %196 : vector<8x64xf32>
    %c1_62 = arith.constant 1 : index
    %c0_63 = arith.constant 0 : index
    %c0_64 = arith.constant 0 : index
    %198 = vector.load %arg3[%c1_62, %c0_63, %c0_64] : memref<2x64x128xf32, #tpu.memory_space<vmem>>, vector<1x64x128xf32>
    %199 = vector.shape_cast %198 : vector<1x64x128xf32> to vector<64x128xf32>
    %cst_65 = arith.constant dense<0.000000e+00> : vector<8x128xf32>
    %200 = tpu.matmul %197, %199, %cst_65 {dimension_numbers = #tpu.dot_dimension_numbers<[1], [0], [0], [1], [0, 0, 1, 1], [], []>} : vector<8x64xf32>, vector<64x128xf32>, vector<8x128xf32> -> vector<8x128xf32>
    %201 = vector.extract_strided_slice %200 {offsets = [0, 0], sizes = [8, 64], strides = [1, 1]} : vector<8x128xf32> to vector<8x64xf32>
    %202 = vector.extract_strided_slice %201 {offsets = [0, 0], sizes = [8, 8], strides = [1, 1]} : vector<8x64xf32> to vector<8x8xf32>
    %203 = vector.extract_strided_slice %201 {offsets = [0, 8], sizes = [8, 8], strides = [1, 1]} : vector<8x64xf32> to vector<8x8xf32>
    %204 = arith.mulf %202, %9 : vector<8x8xf32>
    %205 = arith.mulf %203, %10 : vector<8x8xf32>
    %206 = arith.subf %204, %205 : vector<8x8xf32>
    %207 = arith.mulf %202, %10 : vector<8x8xf32>
    %208 = arith.mulf %203, %9 : vector<8x8xf32>
    %209 = arith.addf %207, %208 : vector<8x8xf32>
    %210 = vector.extract_strided_slice %201 {offsets = [0, 16], sizes = [8, 8], strides = [1, 1]} : vector<8x64xf32> to vector<8x8xf32>
    %211 = vector.extract_strided_slice %201 {offsets = [0, 24], sizes = [8, 8], strides = [1, 1]} : vector<8x64xf32> to vector<8x8xf32>
    %212 = arith.mulf %210, %9 : vector<8x8xf32>
    %213 = arith.mulf %211, %10 : vector<8x8xf32>
    %214 = arith.subf %212, %213 : vector<8x8xf32>
    %215 = arith.mulf %210, %10 : vector<8x8xf32>
    %216 = arith.mulf %211, %9 : vector<8x8xf32>
    %217 = arith.addf %215, %216 : vector<8x8xf32>
    %218 = vector.extract_strided_slice %201 {offsets = [0, 32], sizes = [8, 8], strides = [1, 1]} : vector<8x64xf32> to vector<8x8xf32>
    %219 = vector.extract_strided_slice %201 {offsets = [0, 40], sizes = [8, 8], strides = [1, 1]} : vector<8x64xf32> to vector<8x8xf32>
    %220 = arith.mulf %218, %9 : vector<8x8xf32>
    %221 = arith.mulf %219, %10 : vector<8x8xf32>
    %222 = arith.subf %220, %221 : vector<8x8xf32>
    %223 = arith.mulf %218, %10 : vector<8x8xf32>
    %224 = arith.mulf %219, %9 : vector<8x8xf32>
    %225 = arith.addf %223, %224 : vector<8x8xf32>
    %226 = vector.extract_strided_slice %201 {offsets = [0, 48], sizes = [8, 8], strides = [1, 1]} : vector<8x64xf32> to vector<8x8xf32>
    %227 = vector.extract_strided_slice %201 {offsets = [0, 56], sizes = [8, 8], strides = [1, 1]} : vector<8x64xf32> to vector<8x8xf32>
    %228 = arith.mulf %226, %9 : vector<8x8xf32>
    %229 = arith.mulf %227, %10 : vector<8x8xf32>
    %230 = arith.subf %228, %229 : vector<8x8xf32>
    %231 = arith.mulf %226, %10 : vector<8x8xf32>
    %232 = arith.mulf %227, %9 : vector<8x8xf32>
    %233 = arith.addf %231, %232 : vector<8x8xf32>
    %234 = tpu.concatenate %206, %209, %214, %217, %222, %225, %230, %233 in 1 : vector<8x8xf32>, vector<8x8xf32>, vector<8x8xf32>, vector<8x8xf32>, vector<8x8xf32>, vector<8x8xf32>, vector<8x8xf32>, vector<8x8xf32> -> vector<8x64xf32>
    %235 = vector.extract_strided_slice %200 {offsets = [0, 64], sizes = [8, 32], strides = [1, 1]} : vector<8x128xf32> to vector<8x32xf32>
    %236 = vector.extract_strided_slice %235 {offsets = [0, 0], sizes = [8, 8], strides = [1, 1]} : vector<8x32xf32> to vector<8x8xf32>
    %237 = vector.extract_strided_slice %235 {offsets = [0, 8], sizes = [8, 8], strides = [1, 1]} : vector<8x32xf32> to vector<8x8xf32>
    %238 = arith.mulf %236, %9 : vector<8x8xf32>
    %239 = arith.mulf %237, %10 : vector<8x8xf32>
    %240 = arith.subf %238, %239 : vector<8x8xf32>
    %241 = arith.mulf %236, %10 : vector<8x8xf32>
    %242 = arith.mulf %237, %9 : vector<8x8xf32>
    %243 = arith.addf %241, %242 : vector<8x8xf32>
    %244 = vector.extract_strided_slice %235 {offsets = [0, 16], sizes = [8, 8], strides = [1, 1]} : vector<8x32xf32> to vector<8x8xf32>
    %245 = vector.extract_strided_slice %235 {offsets = [0, 24], sizes = [8, 8], strides = [1, 1]} : vector<8x32xf32> to vector<8x8xf32>
    %246 = arith.mulf %244, %9 : vector<8x8xf32>
    %247 = arith.mulf %245, %10 : vector<8x8xf32>
    %248 = arith.subf %246, %247 : vector<8x8xf32>
    %249 = arith.mulf %244, %10 : vector<8x8xf32>
    %250 = arith.mulf %245, %9 : vector<8x8xf32>
    %251 = arith.addf %249, %250 : vector<8x8xf32>
    %252 = tpu.concatenate %240, %243, %248, %251 in 1 : vector<8x8xf32>, vector<8x8xf32>, vector<8x8xf32>, vector<8x8xf32> -> vector<8x32xf32>
    %253 = vector.extract_strided_slice %200 {offsets = [0, 96], sizes = [8, 32], strides = [1, 1]} : vector<8x128xf32> to vector<8x32xf32>
    %254 = vector.extract_strided_slice %234 {offsets = [0, 0], sizes = [8, 16], strides = [1, 1]} : vector<8x64xf32> to vector<8x16xf32>
    %255 = vector.extract_strided_slice %252 {offsets = [0, 0], sizes = [8, 16], strides = [1, 1]} : vector<8x32xf32> to vector<8x16xf32>
    %256 = vector.extract_strided_slice %253 {offsets = [0, 0], sizes = [8, 16], strides = [1, 1]} : vector<8x32xf32> to vector<8x16xf32>
    %cst_66 = arith.constant dense<0.000000e+00> : vector<8x8xf32>
    %257 = tpu.matmul %254, %255, %cst_66 {dimension_numbers = #tpu.dot_dimension_numbers<[1], [1], [0], [0], [0, 0, 1, 0], [], []>} : vector<8x16xf32>, vector<8x16xf32>, vector<8x8xf32> -> vector<8x8xf32>
    %cst_67 = arith.constant 2.500000e-01 : f32
    %258 = vector.broadcast %cst_67 : f32 to vector<8x8xf32>
    %259 = arith.mulf %257, %258 : vector<8x8xf32>
    %cst_68 = arith.constant dense<0xFF800000> : vector<8xf32>
    %260 = vector.multi_reduction <maximumf>, %259, %cst_68 [1] : vector<8x8xf32> to vector<8xf32>
    %261 = vector.shape_cast %260 : vector<8xf32> to vector<8x1xf32>
    %262 = vector.broadcast %261 : vector<8x1xf32> to vector<8x8xf32>
    %263 = arith.subf %259, %262 : vector<8x8xf32>
    %264 = math.exp %263 : vector<8x8xf32>
    %cst_69 = arith.constant dense<0.000000e+00> : vector<8xf32>
    %265 = vector.multi_reduction <add>, %264, %cst_69 [1] : vector<8x8xf32> to vector<8xf32>
    %266 = vector.shape_cast %265 : vector<8xf32> to vector<8x1xf32>
    %267 = tpu.reciprocal %266 {approx = true} : vector<8x1xf32> -> vector<8x1xf32>
    %268 = vector.broadcast %267 : vector<8x1xf32> to vector<8x8xf32>
    %269 = arith.mulf %264, %268 : vector<8x8xf32>
    %cst_70 = arith.constant dense<0.000000e+00> : vector<8x16xf32>
    %270 = tpu.matmul %269, %256, %cst_70 {dimension_numbers = #tpu.dot_dimension_numbers<[1], [0], [0], [1], [0, 0, 1, 1], [], []>} : vector<8x8xf32>, vector<8x16xf32>, vector<8x16xf32> -> vector<8x16xf32>
    %271 = vector.extract_strided_slice %234 {offsets = [0, 16], sizes = [8, 16], strides = [1, 1]} : vector<8x64xf32> to vector<8x16xf32>
    %272 = vector.extract_strided_slice %252 {offsets = [0, 0], sizes = [8, 16], strides = [1, 1]} : vector<8x32xf32> to vector<8x16xf32>
    %273 = vector.extract_strided_slice %253 {offsets = [0, 0], sizes = [8, 16], strides = [1, 1]} : vector<8x32xf32> to vector<8x16xf32>
    %cst_71 = arith.constant dense<0.000000e+00> : vector<8x8xf32>
    %274 = tpu.matmul %271, %272, %cst_71 {dimension_numbers = #tpu.dot_dimension_numbers<[1], [1], [0], [0], [0, 0, 1, 0], [], []>} : vector<8x16xf32>, vector<8x16xf32>, vector<8x8xf32> -> vector<8x8xf32>
    %cst_72 = arith.constant 2.500000e-01 : f32
    %275 = vector.broadcast %cst_72 : f32 to vector<8x8xf32>
    %276 = arith.mulf %274, %275 : vector<8x8xf32>
    %cst_73 = arith.constant dense<0xFF800000> : vector<8xf32>
    %277 = vector.multi_reduction <maximumf>, %276, %cst_73 [1] : vector<8x8xf32> to vector<8xf32>
    %278 = vector.shape_cast %277 : vector<8xf32> to vector<8x1xf32>
    %279 = vector.broadcast %278 : vector<8x1xf32> to vector<8x8xf32>
    %280 = arith.subf %276, %279 : vector<8x8xf32>
    %281 = math.exp %280 : vector<8x8xf32>
    %cst_74 = arith.constant dense<0.000000e+00> : vector<8xf32>
    %282 = vector.multi_reduction <add>, %281, %cst_74 [1] : vector<8x8xf32> to vector<8xf32>
    %283 = vector.shape_cast %282 : vector<8xf32> to vector<8x1xf32>
    %284 = tpu.reciprocal %283 {approx = true} : vector<8x1xf32> -> vector<8x1xf32>
    %285 = vector.broadcast %284 : vector<8x1xf32> to vector<8x8xf32>
    %286 = arith.mulf %281, %285 : vector<8x8xf32>
    %cst_75 = arith.constant dense<0.000000e+00> : vector<8x16xf32>
    %287 = tpu.matmul %286, %273, %cst_75 {dimension_numbers = #tpu.dot_dimension_numbers<[1], [0], [0], [1], [0, 0, 1, 1], [], []>} : vector<8x8xf32>, vector<8x16xf32>, vector<8x16xf32> -> vector<8x16xf32>
    %288 = vector.extract_strided_slice %234 {offsets = [0, 32], sizes = [8, 16], strides = [1, 1]} : vector<8x64xf32> to vector<8x16xf32>
    %289 = vector.extract_strided_slice %252 {offsets = [0, 16], sizes = [8, 16], strides = [1, 1]} : vector<8x32xf32> to vector<8x16xf32>
    %290 = vector.extract_strided_slice %253 {offsets = [0, 16], sizes = [8, 16], strides = [1, 1]} : vector<8x32xf32> to vector<8x16xf32>
    %cst_76 = arith.constant dense<0.000000e+00> : vector<8x8xf32>
    %291 = tpu.matmul %288, %289, %cst_76 {dimension_numbers = #tpu.dot_dimension_numbers<[1], [1], [0], [0], [0, 0, 1, 0], [], []>} : vector<8x16xf32>, vector<8x16xf32>, vector<8x8xf32> -> vector<8x8xf32>
    %cst_77 = arith.constant 2.500000e-01 : f32
    %292 = vector.broadcast %cst_77 : f32 to vector<8x8xf32>
    %293 = arith.mulf %291, %292 : vector<8x8xf32>
    %cst_78 = arith.constant dense<0xFF800000> : vector<8xf32>
    %294 = vector.multi_reduction <maximumf>, %293, %cst_78 [1] : vector<8x8xf32> to vector<8xf32>
    %295 = vector.shape_cast %294 : vector<8xf32> to vector<8x1xf32>
    %296 = vector.broadcast %295 : vector<8x1xf32> to vector<8x8xf32>
    %297 = arith.subf %293, %296 : vector<8x8xf32>
    %298 = math.exp %297 : vector<8x8xf32>
    %cst_79 = arith.constant dense<0.000000e+00> : vector<8xf32>
    %299 = vector.multi_reduction <add>, %298, %cst_79 [1] : vector<8x8xf32> to vector<8xf32>
    %300 = vector.shape_cast %299 : vector<8xf32> to vector<8x1xf32>
    %301 = tpu.reciprocal %300 {approx = true} : vector<8x1xf32> -> vector<8x1xf32>
    %302 = vector.broadcast %301 : vector<8x1xf32> to vector<8x8xf32>
    %303 = arith.mulf %298, %302 : vector<8x8xf32>
    %cst_80 = arith.constant dense<0.000000e+00> : vector<8x16xf32>
    %304 = tpu.matmul %303, %290, %cst_80 {dimension_numbers = #tpu.dot_dimension_numbers<[1], [0], [0], [1], [0, 0, 1, 1], [], []>} : vector<8x8xf32>, vector<8x16xf32>, vector<8x16xf32> -> vector<8x16xf32>
    %305 = vector.extract_strided_slice %234 {offsets = [0, 48], sizes = [8, 16], strides = [1, 1]} : vector<8x64xf32> to vector<8x16xf32>
    %306 = vector.extract_strided_slice %252 {offsets = [0, 16], sizes = [8, 16], strides = [1, 1]} : vector<8x32xf32> to vector<8x16xf32>
    %307 = vector.extract_strided_slice %253 {offsets = [0, 16], sizes = [8, 16], strides = [1, 1]} : vector<8x32xf32> to vector<8x16xf32>
    %cst_81 = arith.constant dense<0.000000e+00> : vector<8x8xf32>
    %308 = tpu.matmul %305, %306, %cst_81 {dimension_numbers = #tpu.dot_dimension_numbers<[1], [1], [0], [0], [0, 0, 1, 0], [], []>} : vector<8x16xf32>, vector<8x16xf32>, vector<8x8xf32> -> vector<8x8xf32>
    %cst_82 = arith.constant 2.500000e-01 : f32
    %309 = vector.broadcast %cst_82 : f32 to vector<8x8xf32>
    %310 = arith.mulf %308, %309 : vector<8x8xf32>
    %cst_83 = arith.constant dense<0xFF800000> : vector<8xf32>
    %311 = vector.multi_reduction <maximumf>, %310, %cst_83 [1] : vector<8x8xf32> to vector<8xf32>
    %312 = vector.shape_cast %311 : vector<8xf32> to vector<8x1xf32>
    %313 = vector.broadcast %312 : vector<8x1xf32> to vector<8x8xf32>
    %314 = arith.subf %310, %313 : vector<8x8xf32>
    %315 = math.exp %314 : vector<8x8xf32>
    %cst_84 = arith.constant dense<0.000000e+00> : vector<8xf32>
    %316 = vector.multi_reduction <add>, %315, %cst_84 [1] : vector<8x8xf32> to vector<8xf32>
    %317 = vector.shape_cast %316 : vector<8xf32> to vector<8x1xf32>
    %318 = tpu.reciprocal %317 {approx = true} : vector<8x1xf32> -> vector<8x1xf32>
    %319 = vector.broadcast %318 : vector<8x1xf32> to vector<8x8xf32>
    %320 = arith.mulf %315, %319 : vector<8x8xf32>
    %cst_85 = arith.constant dense<0.000000e+00> : vector<8x16xf32>
    %321 = tpu.matmul %320, %307, %cst_85 {dimension_numbers = #tpu.dot_dimension_numbers<[1], [0], [0], [1], [0, 0, 1, 1], [], []>} : vector<8x8xf32>, vector<8x16xf32>, vector<8x16xf32> -> vector<8x16xf32>
    %322 = tpu.concatenate %270, %287, %304, %321 in 1 : vector<8x16xf32>, vector<8x16xf32>, vector<8x16xf32>, vector<8x16xf32> -> vector<8x64xf32>
    %c1_86 = arith.constant 1 : index
    %c0_87 = arith.constant 0 : index
    %c0_88 = arith.constant 0 : index
    %323 = vector.load %arg4[%c1_86, %c0_87, %c0_88] : memref<2x64x64xf32, #tpu.memory_space<vmem>>, vector<1x64x64xf32>
    %324 = vector.shape_cast %323 : vector<1x64x64xf32> to vector<64x64xf32>
    %cst_89 = arith.constant dense<0.000000e+00> : vector<8x64xf32>
    %325 = tpu.matmul %322, %324, %cst_89 {dimension_numbers = #tpu.dot_dimension_numbers<[1], [0], [0], [1], [0, 0, 1, 1], [], []>} : vector<8x64xf32>, vector<64x64xf32>, vector<8x64xf32> -> vector<8x64xf32>
    %326 = arith.addf %183, %325 : vector<8x64xf32>
    %c1_90 = arith.constant 1 : index
    %c0_91 = arith.constant 0 : index
    %c0_92 = arith.constant 0 : index
    %327 = vector.load %arg8[%c1_90, %c0_91, %c0_92] : memref<2x1x64xf32, #tpu.memory_space<vmem>>, vector<1x1x64xf32>
    %328 = vector.shape_cast %327 : vector<1x1x64xf32> to vector<1x64xf32>
    %329 = arith.mulf %326, %326 : vector<8x64xf32>
    %cst_93 = arith.constant dense<0.000000e+00> : vector<8xf32>
    %330 = vector.multi_reduction <add>, %329, %cst_93 [1] : vector<8x64xf32> to vector<8xf32>
    %331 = vector.shape_cast %330 : vector<8xf32> to vector<8x1xf32>
    %cst_94 = arith.constant 6.400000e+01 : f32
    %332 = vector.broadcast %cst_94 : f32 to vector<8x1xf32>
    %333 = arith.divf %331, %332 : vector<8x1xf32>
    %cst_95 = arith.constant 9.99999974E-6 : f32
    %334 = vector.broadcast %cst_95 : f32 to vector<8x1xf32>
    %335 = arith.addf %333, %334 : vector<8x1xf32>
    %336 = math.rsqrt %335 : vector<8x1xf32>
    %337 = vector.broadcast %336 : vector<8x1xf32> to vector<8x64xf32>
    %338 = arith.mulf %326, %337 : vector<8x64xf32>
    %339 = vector.broadcast %328 : vector<1x64xf32> to vector<8x64xf32>
    %340 = arith.mulf %338, %339 : vector<8x64xf32>
    %c1_96 = arith.constant 1 : index
    %c0_97 = arith.constant 0 : index
    %c0_98 = arith.constant 0 : index
    %341 = vector.load %arg5[%c1_96, %c0_97, %c0_98] : memref<2x64x384xf32, #tpu.memory_space<vmem>>, vector<1x64x384xf32>
    %342 = vector.shape_cast %341 : vector<1x64x384xf32> to vector<64x384xf32>
    %cst_99 = arith.constant dense<0.000000e+00> : vector<8x384xf32>
    %343 = tpu.matmul %340, %342, %cst_99 {dimension_numbers = #tpu.dot_dimension_numbers<[1], [0], [0], [1], [0, 0, 1, 1], [], []>} : vector<8x64xf32>, vector<64x384xf32>, vector<8x384xf32> -> vector<8x384xf32>
    %344 = vector.extract_strided_slice %343 {offsets = [0, 0], sizes = [8, 192], strides = [1, 1]} : vector<8x384xf32> to vector<8x192xf32>
    %345 = vector.extract_strided_slice %343 {offsets = [0, 192], sizes = [8, 192], strides = [1, 1]} : vector<8x384xf32> to vector<8x192xf32>
    %346 = arith.negf %344 : vector<8x192xf32>
    %347 = math.exp %346 : vector<8x192xf32>
    %cst_100 = arith.constant 1.000000e+00 : f32
    %348 = vector.broadcast %cst_100 : f32 to vector<8x192xf32>
    %349 = arith.addf %348, %347 : vector<8x192xf32>
    %350 = arith.divf %348, %349 : vector<8x192xf32>
    %351 = arith.mulf %344, %350 : vector<8x192xf32>
    %352 = arith.mulf %351, %345 : vector<8x192xf32>
    %c1_101 = arith.constant 1 : index
    %c0_102 = arith.constant 0 : index
    %c0_103 = arith.constant 0 : index
    %353 = vector.load %arg6[%c1_101, %c0_102, %c0_103] : memref<2x192x64xf32, #tpu.memory_space<vmem>>, vector<1x192x64xf32>
    %354 = vector.shape_cast %353 : vector<1x192x64xf32> to vector<192x64xf32>
    %cst_104 = arith.constant dense<0.000000e+00> : vector<8x64xf32>
    %355 = tpu.matmul %352, %354, %cst_104 {dimension_numbers = #tpu.dot_dimension_numbers<[1], [0], [0], [1], [0, 0, 1, 1], [], []>} : vector<8x192xf32>, vector<192x64xf32>, vector<8x64xf32> -> vector<8x64xf32>
    %356 = arith.addf %326, %355 : vector<8x64xf32>
    %c0_105 = arith.constant 0 : index
    %c0_106 = arith.constant 0 : index
    %357 = vector.load %arg9[%c0_105, %c0_106] : memref<1x64xf32, #tpu.memory_space<vmem>>, vector<1x64xf32>
    %358 = arith.mulf %356, %356 : vector<8x64xf32>
    %cst_107 = arith.constant dense<0.000000e+00> : vector<8xf32>
    %359 = vector.multi_reduction <add>, %358, %cst_107 [1] : vector<8x64xf32> to vector<8xf32>
    %360 = vector.shape_cast %359 : vector<8xf32> to vector<8x1xf32>
    %cst_108 = arith.constant 6.400000e+01 : f32
    %361 = vector.broadcast %cst_108 : f32 to vector<8x1xf32>
    %362 = arith.divf %360, %361 : vector<8x1xf32>
    %cst_109 = arith.constant 9.99999974E-6 : f32
    %363 = vector.broadcast %cst_109 : f32 to vector<8x1xf32>
    %364 = arith.addf %362, %363 : vector<8x1xf32>
    %365 = math.rsqrt %364 : vector<8x1xf32>
    %366 = vector.broadcast %365 : vector<8x1xf32> to vector<8x64xf32>
    %367 = arith.mulf %356, %366 : vector<8x64xf32>
    %368 = vector.broadcast %357 : vector<1x64xf32> to vector<8x64xf32>
    %369 = arith.mulf %367, %368 : vector<8x64xf32>
    %cst_110 = arith.constant dense<0.000000e+00> : vector<8x256xf32>
    %370 = tpu.matmul %369, %2, %cst_110 {dimension_numbers = #tpu.dot_dimension_numbers<[1], [1], [0], [0], [0, 0, 1, 0], [], []>} : vector<8x64xf32>, vector<256x64xf32>, vector<8x256xf32> -> vector<8x256xf32>
    %c0_111 = arith.constant 0 : index
    %c0_112 = arith.constant 0 : index
    %c0_113 = arith.constant 0 : index
    %371 = vector.load %arg12[%c0_111, %c0_112, %c0_113] : memref<1x8x256xf32, #tpu.memory_space<vmem>>, vector<1x8x256xf32>
    %372 = vector.shape_cast %371 : vector<1x8x256xf32> to vector<8x256xf32>
    %373 = vector.shape_cast %370 : vector<8x256xf32> to vector<1x8x256xf32>
    tpu.vector_store %arg12[%c0_111, %c0_112, %c0_113], %373 {strides = array<i32>} : memref<1x8x256xf32, #tpu.memory_space<vmem>>, vector<1x8x256xf32>,
    return
  }
  func.func @transform_0(%arg0: i32) -> (i32, i32, i32) {
    %c0_i32 = arith.constant 0 : i32
    %c0_i32_0 = arith.constant 0 : i32
    %c0_i32_1 = arith.constant 0 : i32
    return %arg0, %c0_i32, %c0_i32_0 : i32, i32, i32
  }
  func.func @transform_1(%arg0: i32) -> (i32, i32) {
    %c0_i32 = arith.constant 0 : i32
    %c0_i32_0 = arith.constant 0 : i32
    %c0_i32_1 = arith.constant 0 : i32
    return %c0_i32, %c0_i32_0 : i32, i32
  }
  func.func @transform_2(%arg0: i32) -> (i32, i32, i32) {
    %c0_i32 = arith.constant 0 : i32
    %c0_i32_0 = arith.constant 0 : i32
    %c0_i32_1 = arith.constant 0 : i32
    %c0_i32_2 = arith.constant 0 : i32
    return %c0_i32, %c0_i32_0, %c0_i32_1 : i32, i32, i32
  }
  func.func @transform_3(%arg0: i32) -> (i32, i32, i32) {
    %c0_i32 = arith.constant 0 : i32
    %c0_i32_0 = arith.constant 0 : i32
    %c0_i32_1 = arith.constant 0 : i32
    %c0_i32_2 = arith.constant 0 : i32
    return %c0_i32, %c0_i32_0, %c0_i32_1 : i32, i32, i32
  }
  func.func @transform_4(%arg0: i32) -> (i32, i32, i32) {
    %c0_i32 = arith.constant 0 : i32
    %c0_i32_0 = arith.constant 0 : i32
    %c0_i32_1 = arith.constant 0 : i32
    %c0_i32_2 = arith.constant 0 : i32
    return %c0_i32, %c0_i32_0, %c0_i32_1 : i32, i32, i32
  }
  func.func @transform_5(%arg0: i32) -> (i32, i32, i32) {
    %c0_i32 = arith.constant 0 : i32
    %c0_i32_0 = arith.constant 0 : i32
    %c0_i32_1 = arith.constant 0 : i32
    %c0_i32_2 = arith.constant 0 : i32
    return %c0_i32, %c0_i32_0, %c0_i32_1 : i32, i32, i32
  }
  func.func @transform_6(%arg0: i32) -> (i32, i32, i32) {
    %c0_i32 = arith.constant 0 : i32
    %c0_i32_0 = arith.constant 0 : i32
    %c0_i32_1 = arith.constant 0 : i32
    %c0_i32_2 = arith.constant 0 : i32
    return %c0_i32, %c0_i32_0, %c0_i32_1 : i32, i32, i32
  }
  func.func @transform_7(%arg0: i32) -> (i32, i32, i32) {
    %c0_i32 = arith.constant 0 : i32
    %c0_i32_0 = arith.constant 0 : i32
    %c0_i32_1 = arith.constant 0 : i32
    %c0_i32_2 = arith.constant 0 : i32
    return %c0_i32, %c0_i32_0, %c0_i32_1 : i32, i32, i32
  }
  func.func @transform_8(%arg0: i32) -> (i32, i32) {
    %c0_i32 = arith.constant 0 : i32
    %c0_i32_0 = arith.constant 0 : i32
    %c0_i32_1 = arith.constant 0 : i32
    return %c0_i32, %c0_i32_0 : i32, i32
  }
  func.func @transform_9(%arg0: i32) -> (i32, i32) {
    %c0_i32 = arith.constant 0 : i32
    %c0_i32_0 = arith.constant 0 : i32
    %c0_i32_1 = arith.constant 0 : i32
    return %c0_i32, %c0_i32_0 : i32, i32
  }
  func.func @transform_10(%arg0: i32) -> (i32, i32) {
    %c0_i32 = arith.constant 0 : i32
    %c0_i32_0 = arith.constant 0 : i32
    %c0_i32_1 = arith.constant 0 : i32
    return %c0_i32, %c0_i32_0 : i32, i32
  }
  func.func @transform_11(%arg0: i32) -> (i32, i32, i32) {
    %c0_i32 = arith.constant 0 : i32
    %c0_i32_0 = arith.constant 0 : i32
    %c0_i32_1 = arith.constant 0 : i32
    return %arg0, %c0_i32, %c0_i32_0 : i32, i32, i32
  }
}

</mosaic_0001>

<bundles_post_ra>
// kernel: transformer_forward.1
= control target key start
LH: loop header
LB: loop body
LE: loop exit
PB: predicated region body
PF: predicated region fallthrough
CT: control target
= control target key end

     0   :  { %16 = vsyncpa [#allocation3], 0  ;;  %s5604_s0 = inlined_call_operand.vmem [shape: s32[2,8,1], index: 0, kind: input, shape index: {}]   ;;  %s5605_s1 = inlined_call_operand.vmem [shape: f32[256,64], index: 1, kind: input, shape index: {}]   ;;  %s5606_s2 = inlined_call_operand.vmem [shape: f32[2,64,128], index: 2, kind: input, shape index: {}]   ;;  %s5607_s3 = inlined_call_operand.vmem [shape: f32[2,64,64], index: 3, kind: input, shape index: {}]   ;;  %s5608_s4 = inlined_call_operand.vmem [shape: f32[2,64,384], index: 4, kind: input, shape index: {}]   ;;  %s5609_s5 = inlined_call_operand.vmem [shape: f32[2,192,64], index: 5, kind: input, shape index: {}]   ;;  %s5610_s6 = inlined_call_operand.vmem [shape: f32[2,1,64], index: 6, kind: input, shape index: {}]   ;;  %s5611_s7 = inlined_call_operand.vmem [shape: f32[2,1,64], index: 7, kind: input, shape index: {}]   ;;  %s5612_s8 = inlined_call_operand.vmem [shape: f32[1,64], index: 8, kind: input, shape index: {}]   ;;  %s5613_s9 = inlined_call_operand.vmem [shape: f32[8,8], index: 9, kind: input, shape index: {}]   ;;  %s5614_s10 = inlined_call_operand.vmem [shape: f32[8,8], index: 10, kind: input, shape index: {}]   ;;  %s5615_s11 = inlined_call_operand.hbm [shape: f32[2,8,256], index: 11, kind: output, shape index: {}]  }
   0x1   :  { %18 = vsyncpa [#allocation3 + $0x1], 0  ;;  %s4422_s17 = smov 0   ;;  %s4424_s18 = smov 0  }
   0x2   :  { %s4426_s19 = smov 0   ;;  %s4428_s20 = smov 0  }
   0x3 LB: > { %s4443_s21 = sadd.s32 4294967295, %s4340_s20   ;;  %s3396_s22 = sadd.s32 4294967294, %s4340_s20   ;;  %s4340_s20 = sphi %s4428_s20, %s5649_s20   ;;  %s4336_s19 = sphi %s4426_s19, %s5648_s19   ;;  %s4332_s18 = sphi %s4424_s18, %s5647_s18   ;;  %s4328_s17 = sphi %s4422_s17, %s5646_s17  }
   0x4   : > { %s4447_s23 = sadd.s32 1, %s4340_s20   ;;  %s267_s24 = sadd.s32 1, %s4336_s19 }
   0x5   : > { %s264_s25 = ssub.s32 %s4340_s20, %s4447_s23  ;;  %p277_p0 = scmp.ne.s32.totalorder %s4336_s19, %s4332_s18 }
   0x6   : > { %p265_p1 = scmp.eq.s32.totalorder %s264_s25, 0  ;;  %p278_p2 = scmp.eq.s32.totalorder %s4443_s21, 1 }
   0x7   : > { %p283_p3 = scmp.ne.s32.totalorder %s4332_s18, %s4328_s17  ;;  %p284_p4 = scmp.eq.s32.totalorder %s3396_s22, 1 }
   0x8   : > { %s4458_s26 = scalar_select %p265_p1, %s4336_s19, %s267_s24  }
   0x9   : > { %p4460_p5 = por %p278_p2, %p277_p0  ;;  %p4464_p6 = por %p284_p4, %p283_p3 }
   0xa   : > { %5631 = sst [smem:[#allocation5_spill]] %s4458_s26  ;;  %p3399_p7 = scmp.ge.s32.totalorder %s4340_s20, 1 }
   0xb   : > { %p339_p8 = scmp.lt.s32.totalorder %s4340_s20, 3 }
   0xd   : > { %p340_p9 = pnand %p3399_p7, %p339_p8 }
   0xe   : > { %p378_p10 = scmp.lt.s32.totalorder (!%p340_p9), %s4443_s21, 1  ;;  %v399_v0 = vld [vmem:[%s5605_s1 + $0x80] sm:$0xff] (!%p340_p9)  ;;  %v400_v1 = vld [vmem:[%s5605_s1 + $0x88] sm:$0xff] (!%p340_p9)  ;;  %v4342_v3 = vmov (!%p340_p9), 0   ;;  %v401_v6 = vld [vmem:[%s5605_s1 + $0x90] sm:$0xff] (!%p340_p9)  ;;  %v415_v50 = vlaneseq (!%p340_p9)  ;;  %v4343_v54 = vmov (!%p340_p9), 1.0  }
   0xf   : > { %343 = sbr.rel (%p340_p9) target bundleno = 7202 (0x1c22), region = 64  ;;  %v383_v2 = vld [vmem:[%s5605_s1] sm:$0xff] (!%p340_p9)  ;;  %4217 = vset.pattern.permute.xlu0 (!%p340_p9), %v4342_v3  ;;  %v4480_v4 = vpack.c.bf16 (!%p340_p9), %v400_v1, %v399_v0  ;;  %v384_v5 = vld [vmem:[%s5605_s1 + $0x8] sm:$0xff] (!%p340_p9)  ;;  %v402_v7 = vld [vmem:[%s5605_s1 + $0x98] sm:$0xff] (!%p340_p9)  ;;  %vm501_vm2 = vcmask (!%p340_p9), 523264   ;;  %v4344_v63 = vmov (!%p340_p9), 0.0|0.0  }
  0x10   : > { %v4492_v8 = vpack.c.bf16 (!%p340_p9), %v384_v5, %v383_v2  ;;  %v4494_v9 = vpack.c.bf16 (!%p340_p9), %v402_v7, %v401_v6  ;;  %v385_v10 = vld [vmem:[%s5605_s1 + $0x10] sm:$0xff] (!%p340_p9)  ;;  %v386_v11 = vld [vmem:[%s5605_s1 + $0x18] sm:$0xff] (!%p340_p9)  ;;  %v403_v12 = vld [vmem:[%s5605_s1 + $0xa0] sm:$0xff] (!%p340_p9)  ;;  %v416_v51 = vand.u32 (!%p340_p9), 127, %v415_v50  ;;  %3935 = vmatprep.subr.bf16.mxu1 (!%p340_p9), %v4344_v63  ;;  %vm4345_vm3 = vmmov (!%p340_p9), 0   ;;  %s5622_s13 = smov (!%p340_p9), 8  }
  0x11   : > { %3904 = vmatprep.subr.bf16.mxu0 (!%p340_p9), %v4480_v4  ;;  %v404_v13 = vld [vmem:[%s5605_s1 + $0xa8] sm:$0xff] (!%p340_p9)  ;;  %v4510_v14 = vpack.c.bf16 (!%p340_p9), %v386_v11, %v385_v10  ;;  %v387_v16 = vld [vmem:[%s5605_s1 + $0x20] sm:$0xff] (!%p340_p9)  ;;  %v405_v19 = vld [vmem:[%s5605_s1 + $0xb0] sm:$0xff] (!%p340_p9)  ;;  %v4346_v6 = vmov (!%p340_p9), 0.0   ;;  %s5620_s16 = smov (!%p340_p9), 72   ;;  %s5616_s22 = smov (!%p340_p9), 80  }
  0x12   : > { %3906 = vmatpush3.bf16.msra.mxu0 (!%p340_p9), %v4492_v8  ;;  %v4516_v15 = vpack.c.bf16 (!%p340_p9), %v404_v13, %v403_v12  ;;  %v388_v17 = vld [vmem:[%s5605_s1 + $0x28] sm:$0xff] (!%p340_p9)  ;;  %v406_v20 = vld [vmem:[%s5605_s1 + $0xb8] sm:$0xff] (!%p340_p9)  ;;  %v389_v23 = vld [vmem:[%s5605_s1 + $0x30] sm:$0xff] (!%p340_p9)  ;;  %v417_v52 = vadd.s32 (!%p340_p9), 128, %v416_v51  ;;  %3725 = vmatprep.mubr.msk.f32.mxu1 (!%p340_p9), %vm4345_vm3, %v4346_v6  ;;  %s4351_s26 = smov (!%p340_p9), 32   ;;  %s4352_s24 = smov (!%p340_p9), 56  }
  0x13   : > { %3908 = vmatprep.subr.bf16.mxu0 (!%p340_p9), %v4494_v9  ;;  %v4531_v21 = vpack.c.bf16 (!%p340_p9), %v388_v17, %v387_v16  ;;  %v4534_v22 = vpack.c.bf16 (!%p340_p9), %v406_v20, %v405_v19  ;;  %v390_v24 = vld [vmem:[%s5605_s1 + $0x38] sm:$0xff] (!%p340_p9)  ;;  %v407_v25 = vld [vmem:[%s5605_s1 + $0xc0] sm:$0xff] (!%p340_p9)  ;;  %v408_v26 = vld [vmem:[%s5605_s1 + $0xc8] sm:$0xff] (!%p340_p9)  ;;  %s4353_s25 = smov (!%p340_p9), 88   ;;  %s5626_s29 = smov (!%p340_p9), 64   ;;  %vm714_vm4 = vcmask (!%p340_p9), 64512  }
  0x14   : > { %v4549_v27 = vpack.c.bf16 (!%p340_p9), %v390_v24, %v389_v23  ;;  %v4552_v28 = vpack.c.bf16 (!%p340_p9), %v408_v26, %v407_v25  ;;  %v391_v29 = vld [vmem:[%s5605_s1 + $0x40] sm:$0xff] (!%p340_p9)  ;;  %v392_v30 = vld [vmem:[%s5605_s1 + $0x48] sm:$0xff] (!%p340_p9)  ;;  %v409_v31 = vld [vmem:[%s5605_s1 + $0xd0] sm:$0xff] (!%p340_p9)  ;;  %vm716_vm5 = vcmask (!%p340_p9), 130048   ;;  %vm718_vm6 = vcmask (!%p340_p9), 195584   ;;  %s5617_s14 = smov (!%p340_p9), 96  }
  0x15   : > { %v410_v32 = vld [vmem:[%s5605_s1 + $0xd8] sm:$0xff] (!%p340_p9)  ;;  %v4567_v33 = vpack.c.bf16 (!%p340_p9), %v392_v30, %v391_v29  ;;  %v393_v35 = vld [vmem:[%s5605_s1 + $0x50] sm:$0xff] (!%p340_p9)  ;;  %v411_v37 = vld [vmem:[%s5605_s1 + $0xe0] sm:$0xff] (!%p340_p9)  ;;  %vm720_vm7 = vcmask (!%p340_p9), 261120   ;;  %vm722_vm8 = vcmask (!%p340_p9), 326656   ;;  %vm724_vm9 = vcmask (!%p340_p9), 392192  }
  0x16   : > { %s379_s12 = scalar_select %p378_p10, %s4443_s21, 1  ;;  %3910 = vmatpush3.bf16.msra.mxu0 %v4510_v14  ;;  %v4570_v34 = vpack.c.bf16 %v410_v32, %v409_v31  ;;  %v394_v36 = vld [vmem:[%s5605_s1 + $0x58] sm:$0xff]  ;;  %v412_v38 = vld [vmem:[%s5605_s1 + $0xe8] sm:$0xff]  ;;  %v395_v41 = vld [vmem:[%s5605_s1 + $0x60] sm:$0xff]  ;;  %vm726_vm10 = vcmask 457728  }
  0x17   : > { %3912 = vmatprep.subr.bf16.mxu0 %v4516_v15  ;;  %v4585_v39 = vpack.c.bf16 %v394_v36, %v393_v35  ;;  %v4588_v40 = vpack.c.bf16 %v412_v38, %v411_v37  ;;  %v396_v42 = vld [vmem:[%s5605_s1 + $0x68] sm:$0xff]  ;;  %v413_v43 = vld [vmem:[%s5605_s1 + $0xf0] sm:$0xff]  ;;  %v414_v44 = vld [vmem:[%s5605_s1 + $0xf8] sm:$0xff] }
  0x18   : > { %s3401_s30 = sshll.u32 %s379_s12, 3  ;;  %v4603_v45 = vpack.c.bf16 %v396_v42, %v395_v41  ;;  %v4606_v46 = vpack.c.bf16 %v414_v44, %v413_v43  ;;  %v397_v47 = vld [vmem:[%s5605_s1 + $0x70] sm:$0xff]  ;;  %v398_v48 = vld [vmem:[%s5605_s1 + $0x78] sm:$0xff]  ;;  %v517_v60 = vld [vmem:[%s5606_s2] sm:$0xff]  ;;  %s4354_s12 = smov 40  }
  0x19   : > { %s381_s15 = scalar_lea.vmem %s5604_s0, %s3401_s30  ;;  %v4615_v49 = vpack.c.bf16 %v398_v48, %v397_v47  ;;  %v518_v61 = vld [vmem:[%s5606_s2 + $0x8] sm:$0xff]  ;;  %v519_v0 = vld [vmem:[%s5606_s2 + $0x10] sm:$0xff]  ;;  %v520_v1 = vld [vmem:[%s5606_s2 + $0x18] sm:$0xff]  ;;  %s5629_s30 = smov 16  }
  0x1a   : > { %v382_v18 = vld [vmem:[%s381_s15] sm:$0xff]  ;;  %3914 = vmatpush3.bf16.msra.mxu0 %v4531_v21  ;;  %v3936_v62 = vpack.c.bf16 %v518_v61, %v517_v60  ;;  %v3939_v2 = vpack.c.bf16 %v520_v1, %v519_v0  ;;  %v522_v5 = vld [vmem:[%s5606_s2 + $0x28] sm:$0xff]  ;;  %v523_v10 = vld [vmem:[%s5606_s2 + $0x30] sm:$0xff]  ;;  %s4348_s15 = smov 24  }
  0x1b   : > { %419 = vperm.xlu0 %4217, %v382_v18   ;;  %3916 = vmatprep.subr.bf16.mxu0 %v4534_v22  ;;  %v521_v3 = vld [vmem:[%s5606_s2 + $0x20] sm:$0xff]  ;;  %v524_v11 = vld [vmem:[%s5606_s2 + $0x38] sm:$0xff]  ;;  %vm5498_vm11 = vmpackc.low %vm501_vm2, %vm501_vm2 }
  0x1c   : > { %3937 = vmatpush3.bf16.msra.mxu1 %v3936_v62  ;;  %v3942_v7 = vpack.c.bf16 %v522_v5, %v521_v3  ;;  %v3945_v12 = vpack.c.bf16 %v524_v11, %v523_v10  ;;  %v4661_v13 = vld [vmem:[%s5613_s9] sm:$0xff] }
  0x1d   : > { %3938 = vmatprep.subr.bf16.mxu1 %v4344_v63  ;;  %611 = vrot.lane.b32.xlu1 %v4661_v13, %s5622_s13  ;;  %v4668_v16 = vld [vmem:[%s5614_s10] sm:$0xff] }
  0x1e   : > { %3918 = vmatpush3.bf16.msra.mxu0 %v4549_v27  ;;  %v3406_v23 = vld [vmem:[%s5610_s6] ss:$0 sm:$0xff] }
  0x1f   : > { %3920 = vmatprep.subr.bf16.mxu0 %v4552_v28 }
  0x20   : > { %3940 = vmatpush3.bf16.msra.mxu1 %v3939_v2 }
  0x21   : > { %3941 = vmatprep.subr.bf16.mxu1 %v4344_v63  ;;  %732 = vrot.lane.b32.xlu1 %v4668_v16, %s5620_s16 }
  0x22   : > { %3922 = vmatpush3.bf16.msra.mxu0 %v4567_v33 }
  0x23   : > { %3924 = vmatprep.subr.bf16.mxu0 %v4570_v34 }
  0x24   : > { %3943 = vmatpush3.bf16.msra.mxu1 %v3942_v7 }
  0x25   : > { %3944 = vmatprep.subr.bf16.mxu1 %v4344_v63  ;;  %745 = vrot.lane.b32.xlu1 %v4661_v13, %s5620_s16 }
  0x26   : > { %3926 = vmatpush3.bf16.msra.mxu0 %v4585_v39 }
  0x27   : > { %3928 = vmatprep.subr.bf16.mxu0 %v4588_v40 }
  0x28   : > { %3946 = vmatpush3.bf16.msra.mxu1 %v3945_v12 }
  0x29   : > { %3728 = vmatprep.subr.mxu1 %v4346_v6  ;;  %637 = vrot.lane.b32.xlu1 %v4661_v13, %s4348_s15 }
  0x2a   : > { %3930 = vmatpush3.bf16.msra.mxu0 %v4603_v45 }
  0x2b   : > { %3932 = vmatprep.subr.bf16.mxu0 %v4606_v46 }
  0x2d   : > { %758 = vrot.lane.b32.xlu1 %v4668_v16, %s4353_s25 }
  0x2e   : > { %3934 = vmatpush3.bf16.msra.mxu0 %v4615_v49 }
  0x2f   : > { %3748 = vmatprep.subr.mxu0 %v4346_v6 }
  0x31   : > { %771 = vrot.lane.b32.xlu1 %v4661_v13, %s4353_s25  ;;  %s5628_s25 = smov 48  }
  0x35   : > { %663 = vrot.lane.b32.xlu1 %v4661_v13, %s4354_s12 }
  0x39   : > { %689 = vrot.lane.b32.xlu1 %v4661_v13, %s4352_s24 }
  0x3d   : > { %600 = vrot.lane.b32.xlu1 %v4668_v16, %s5622_s13 }
  0x41   : > { %728 = vrot.lane.b32.xlu1 %v4661_v13, %s5626_s29 }
  0x45   : > { %741 = vrot.lane.b32.xlu1 %v4668_v16, %s5626_s29 }
  0x49   : > { %633 = vrot.lane.b32.xlu1 %v4668_v16, %s5629_s30 }
  0x4d   : > { %754 = vrot.lane.b32.xlu1 %v4661_v13, %s5616_s22 }
  0x51   : > { %650 = vrot.lane.b32.xlu1 %v4668_v16, %s4354_s12  ;;  %s5618_s12 = smov 112  }
  0x8f   : > { %v4703_v26 = vpop.permute.xlu1 %611 }
  0x93   : > { %v4705_v29 = vpop.permute.xlu1 %732 }
  0x97   : > { %v4707_v30 = vpop.permute.xlu1 %745 }
  0x9a   : > { %v420_v53 = vpop.permute.xlu0 %419 }
  0x9b   : > { %vm421_vm0 = vcmp.eq.s32.totalorder %v416_v51, %v420_v53  ;;  %vm422_vm1 = vcmp.eq.s32.totalorder %v417_v52, %v420_v53  ;;  %v4709_v31 = vpop.permute.xlu1 %637 }
  0x9c   : > { %3404 = vmatprep.mubr.msk.f32.mxu0 %vm422_vm1, %v4343_v54 }
  0x9d   : > { %3405 = vmatmul.mubr.msk.f32.vlgmr.msra.gmra.mrb[0].mxu0 %vm421_vm0, %v4343_v54 }
  0x9e   : > { %3750 = vmatprep.mubr.msk.f32.mxu0 %vm4345_vm3, %v4346_v6 }
  0x9f   : > { %v4711_v32 = vpop.permute.xlu1 %758 }
  0xa3   : > { %v4713_v35 = vpop.permute.xlu1 %771 }
  0xa7   : > { %v4715_v36 = vpop.permute.xlu1 %663 }
  0xab   : > { %v4717_v37 = vpop.permute.xlu1 %689 }
  0xaf   : > { %v4719_v38 = vpop.permute.xlu1 %600 }
  0xb3   : > { %v4721_v41 = vpop.permute.xlu1 %728 }
  0xb7   : > { %v4723_v42 = vpop.permute.xlu1 %741 }
  0xbb   : > { %v4739_v53 = vpop.permute.xlu1 %633 }
 0x170   : > { %v3586_v55 = vpop.f32.mrb[0].mxu0 }
 0x171   : > { %v3587_v56 = vpop.f32.mrb[1].mxu0 }
 0x172   : > { %v4619_v57 = vadd.f32 %v3587_v56, %v3586_v55 }
 0x174   : > { %v500_v58 = vmul.f32 %v4619_v57, %v4619_v57 }
 0x176   : > { %v502_v59 = vsel %vm501_vm2, %v500_v58, 0.0  ;;  %v4751_v58 = vpop.permute.xlu1 %754 }
 0x177   : > { %503 = vadd.xlane.f32.xlu0 %v502_v59 }
 0x17a   : > { %v4764_v0 = vpop.permute.xlu1 %650 }
 0x18d   : > { %624 = vrot.lane.b32.xlu0 %v4668_v16, %s4348_s15 }
 0x191   : > { %767 = vrot.lane.b32.xlu0 %v4668_v16, %s5616_s22 }
 0x195   : > { %659 = vrot.lane.b32.xlu0 %v4668_v16, %s4351_s26 }
 0x199   : > { %676 = vrot.lane.b32.xlu0 %v4668_v16, %s4352_s24  ;;  %s5624_s24 = smov 120  }
 0x204   : > { %v504_v17 = vpop.xlane.xlu0 %503 }
 0x205   : > { %v506_v18 = vmul.f32 0.015625, %v504_v17 }
 0x207   : > { %v507_v19 = vadd.f32 1e-05, %v506_v18 }
 0x208   : > { %v4733_v50 = vpop.permute.xlu0 %624 }
 0x209   : > { %4218 = vrsqrt.f32 %v507_v19 }
 0x20c   : > { %v4747_v56 = vpop.permute.xlu0 %767 }
 0x210   : > { %v4758_v60 = vpop.permute.xlu0 %659 }
 0x213   : > { %v4219_v20 = vpop.eup %4218 }
 0x214   : > { %v509_v24 = vmul.f32 %v4219_v20, %v4619_v57  ;;  %v4770_v2 = vpop.permute.xlu0 %676 }
 0x216   : > { %v516_v25 = vmul.f32 %v3406_v23, %v509_v24 }
 0x218   : > { %3726 = vmatmul.mubr.msk.f32.vlgmr.msra.gmra.mrb[0].mxu1 %vm501_vm2, %v516_v25 }
 0x219   : > { %3730 = vmatprep.mubr.msk.f32.mxu1 %vm4345_vm3, %v4346_v6 }
 0x2eb   : > { %v4725_v43 = vpop.f32.mrb[0].mxu1 }
 0x2ec   : > { %v3727_v44 = vpop.f32.mrb[1].mxu1  ;;  %v735_v47 = vmul.f32 %v4705_v29, %v4725_v43  ;;  %v614_v48 = vmul.f32 %v4703_v26, %v4725_v43  ;;  %v666_v51 = vmul.f32 %v4715_v36, %v4725_v43  ;;  %v748_v52 = vmul.f32 %v4707_v30, %v4725_v43 }
 0x2ed   : > { %v692_v54 = vmul.f32 %v4717_v37, %v4725_v43  ;;  %v640_v55 = vmul.f32 %v4709_v31, %v4725_v43  ;;  %v761_v59 = vmul.f32 %v4711_v32, %v4725_v43  ;;  %v774_v61 = vmul.f32 %v4713_v35, %v4725_v43 }
 0x2ee   : > { %737 = vrot.lane.b32.xlu0 %v735_v47, %s5624_s24  ;;  %616 = vrot.lane.b32.xlu1 %v614_v48, %s5624_s24  ;;  %v603_v62 = vmul.f32 %v4719_v38, %v4725_v43  ;;  %v653_v1 = vmul.f32 %v4764_v0, %v4725_v43  ;;  %v679_v3 = vmul.f32 %v4770_v2, %v4725_v43 }
 0x2ef   : > { %v627_v5 = vmul.f32 %v4733_v50, %v4725_v43  ;;  %v609_v7 = vmul.f32 %v4725_v43, %v4668_v16  ;;  %v731_v10 = vmul.f32 %v4721_v41, %v4725_v43  ;;  %v744_v19 = vmul.f32 %v4723_v42, %v4725_v43 }
 0x2f0   : > { %v662_v47 = vmul.f32 %v4758_v60, %v4725_v43  ;;  %v757_v48 = vmul.f32 %v4751_v58, %v4725_v43 }
 0x2f2   : > { %668 = vrot.lane.b32.xlu0 %v666_v51, %s5624_s24  ;;  %750 = vrot.lane.b32.xlu1 %v748_v52, %s5624_s24 }
 0x2f6   : > { %694 = vrot.lane.b32.xlu0 %v692_v54, %s5624_s24  ;;  %642 = vrot.lane.b32.xlu1 %v640_v55, %s5624_s24  ;;  %v770_v55 = vmul.f32 %v4747_v56, %v4725_v43 }
 0x2fa   : > { %646 = vrot.lane.b32.xlu0 %v4661_v13, %s4351_s26  ;;  %763 = vrot.lane.b32.xlu1 %v761_v59, %s5624_s24 }
 0x2fe   : > { %776 = vrot.lane.b32.xlu1 %v774_v61, %s5624_s24  ;;  %605 = vrot.lane.b32.xlu0 %v603_v62, %s5624_s24 }
 0x302   : > { %685 = vrot.lane.b32.xlu1 %v4668_v16, %s5628_s25  ;;  %655 = vrot.lane.b32.xlu0 %v653_v1, %s5624_s24  ;;  %v636_v16 = vmul.f32 %v4739_v53, %v4725_v43 }
 0x306   : > { %620 = vrot.lane.b32.xlu1 %v4661_v13, %s5629_s30  ;;  %681 = vrot.lane.b32.xlu0 %v679_v3, %s5624_s24 }
 0x30a   : > { %672 = vrot.lane.b32.xlu1 %v4661_v13, %s5628_s25 }
 0x30e   : > { %629 = vrot.lane.b32.xlu1 %v627_v5, %s5624_s24  ;;  %s5635_s24 = smov 120  }
 0x360   : > { %v617_v11 = vpop.permute.xlu1 %616  ;;  %v738_v12 = vpop.permute.xlu0 %737 }
 0x361   : > { %v619_v17 = vadd.f32 %v617_v11, %v609_v7  ;;  %v740_v18 = vsub.f32 %v731_v10, %v738_v12 }
 0x363   : > { %699 = vrot.lane.b32.xlu1 %v619_v17, %s5622_s13  ;;  %781 = vrot.lane.b32.xlu0 %v740_v18, %s5626_s29 }
 0x364   : > { %v751_v20 = vpop.permute.xlu1 %750  ;;  %v669_v44 = vpop.permute.xlu0 %668 }
 0x365   : > { %v753_v23 = vadd.f32 %v751_v20, %v744_v19  ;;  %v671_v52 = vadd.f32 %v669_v44, %v662_v47 }
 0x367   : > { %785 = vrot.lane.b32.xlu1 %v753_v23, %s5620_s16 }
 0x368   : > { %v643_v24 = vpop.permute.xlu1 %642  ;;  %v695_v3 = vpop.permute.xlu0 %694 }
 0x369   : > { %v645_v25 = vadd.f32 %v643_v24, %v636_v16  ;;  %v598_v16 = vmul.f32 %v4725_v43, %v4661_v13 }
 0x36b   : > { %703 = vrot.lane.b32.xlu0 %v645_v25, %s5622_s13 }
 0x36c   : > { %v764_v51 = vpop.permute.xlu1 %763  ;;  %v4811_v7 = vpop.permute.xlu0 %646 }
 0x36d   : > { %v766_v54 = vsub.f32 %v757_v48, %v764_v51 }
 0x36f   : > { %789 = vrot.lane.b32.xlu1 %v766_v54, %s5626_s29  ;;  %707 = vrot.lane.b32.xlu0 %v671_v52, %s5622_s13  ;;  %v649_v54 = vmul.f32 %v4811_v7, %v4725_v43  ;;  %s5634_s29 = smov 64  }
 0x370   : > { %v777_v59 = vpop.permute.xlu1 %776  ;;  %v606_v11 = vpop.permute.xlu0 %605 }
 0x371   : > { %v779_v61 = vadd.f32 %v777_v59, %v770_v55  ;;  %v608_v25 = vsub.f32 %v598_v16, %v606_v11 }
 0x373   : > { %793 = vrot.lane.b32.xlu1 %v779_v61, %s5620_s16 }
 0x374   : > { %v4806_v62 = vpop.permute.xlu1 %685  ;;  %v656_v17 = vpop.permute.xlu0 %655 }
 0x375   : > { %v688_v1 = vmul.f32 %v4806_v62, %v4725_v43  ;;  %v658_v61 = vsub.f32 %v649_v54, %v656_v17 }
 0x377   : > { %v697_v5 = vadd.f32 %v695_v3, %v688_v1 }
 0x378   : > { %v4813_v10 = vpop.permute.xlu1 %620  ;;  %v682_v19 = vpop.permute.xlu0 %681 }
 0x379   : > { %711 = vrot.lane.b32.xlu1 %v697_v5, %s5622_s13  ;;  %v623_v44 = vmul.f32 %v4813_v10, %v4725_v43 }
 0x37c   : > { %v4815_v12 = vpop.permute.xlu1 %672 }
 0x37d   : > { %v675_v1 = vmul.f32 %v4815_v12, %v4725_v43 }
 0x37f   : > { %v684_v17 = vsub.f32 %v675_v1, %v682_v19 }
 0x380   : > { %v630_v18 = vpop.permute.xlu1 %629 }
 0x381   : > { %v632_v51 = vsub.f32 %v623_v44, %v630_v18 }
 0x3d5   : > { %v700_v20 = vpop.permute.xlu1 %699  ;;  %v782_v23 = vpop.permute.xlu0 %781 }
 0x3d6   : > { %v715_v48 = vsel %vm714_vm4, %v608_v25, %v700_v20 }
 0x3d7   : > { %v717_v55 = vsel %vm716_vm5, %v715_v48, %v632_v51 }
 0x3d9   : > { %v786_v24 = vpop.permute.xlu1 %785 }
 0x3da   : > { %v796_v13 = vsel %vm714_vm4, %v782_v23, %v786_v24 }
 0x3dd   : > { %v704_v47 = vpop.permute.xlu0 %703 }
 0x3de   : > { %v719_v59 = vsel %vm718_vm6, %v717_v55, %v704_v47 }
 0x3df   : > { %v721_v20 = vsel %vm720_vm7, %v719_v59, %v658_v61 }
 0x3e1   : > { %v790_v52 = vpop.permute.xlu1 %789  ;;  %v708_v5 = vpop.permute.xlu0 %707 }
 0x3e2   : > { %v797_v3 = vsel %vm716_vm5, %v796_v13, %v790_v52  ;;  %v723_v23 = vsel %vm722_vm8, %v721_v20, %v708_v5 }
 0x3e3   : > { %v725_v24 = vsel %vm724_vm9, %v723_v23, %v684_v17 }
 0x3e5   : > { %v794_v11 = vpop.permute.xlu1 %793 }
 0x3e6   : > { %v798_v18 = vsel %vm718_vm6, %v797_v3, %v794_v11 }
 0x3e7   : > { %3729 = vmatpush3.xpose.msk.msra.mxu1 %vm716_vm5, %v798_v18 }
 0x3e8   : > { %3733 = vmatprep.subr.mxu1 %v4346_v6 }
 0x3eb   : > { %v712_v16 = vpop.permute.xlu1 %711 }
 0x3ec   : > { %v727_v25 = vsel %vm726_vm10, %v725_v24, %v712_v16 }
 0x3ed   : > { %964 = vrot.lane.b32.xlu1 %v727_v25, %s5618_s12  ;;  %3731 = vmatmul.mubr.msk.f32.vlgmr.msra.gmra.mrb[2].mxu1 %vm716_vm5, %v727_v25 }
 0x3ee   : > { %3735 = vmatprep.mubr.msk.f32.mxu1 %vm4345_vm3, %v4346_v6 }
 0x45f   : > { %v965_v1 = vpop.permute.xlu1 %964 }
 0x4c0   : > { %v871_v44 = vpop.f32.mrb[2].mxu1 }
 0x4c1   : > { %v875_v47 = vmul.f32 0.25, %v871_v44  ;;  %v3732_v48 = vpop.f32.mrb[3].mxu1 }
 0x4c3   : > { %v876_v51 = vsel %vm714_vm4, %v875_v47, -inf }
 0x4c4   : > { %877 = vmax.xlane.f32.xlu0 %v876_v51 }
 0x4da   : > { %888 = vrot.lane.b32.xlu0 %v4725_v43, %s4351_s26 }
 0x4de   : > { %1125 = vrot.lane.b32.xlu0 %v798_v18, %s5618_s12  ;;  %s5636_s12 = smov 8  }
 0x4e2   : > { %1289 = vrot.lane.b32.xlu0 %v727_v25, %s5616_s22  ;;  %s5641_s22 = smov 16  }
 0x551   : > { %v878_v19 = vpop.xlane.xlu0 %877 }
 0x552   : > { %v879_v52 = vsub.f32 %v875_v47, %v878_v19 }
 0x554   : > { %v880_v54 = vmul.f32 1.442695, %v879_v52 }
 0x555   : > { %v889_v55 = vpop.permute.xlu0 %888 }
 0x556   : > { %4220 = vpow2.f32 %v880_v54  ;;  %3734 = vmatpush3.msra.mxu1 %v889_v55 }
 0x557   : > { %3738 = vmatprep.subr.mxu1 %v4346_v6 }
 0x559   : > { %v1126_v13 = vpop.permute.xlu0 %1125 }
 0x55a   : > { %3749 = vmatpush3.xpose.msk.msra.mxu0 %vm716_vm5, %v1126_v13 }
 0x55b   : > { %3758 = vmatprep.subr.mxu0 %v4346_v6 }
 0x55d   : > { %v1290_v11 = vpop.permute.xlu0 %1289 }
 0x560   : > { %v4221_v59 = vpop.eup %4220 }
 0x561   : > { %v882_v61 = vsel %vm714_vm4, %v4221_v59, 0.0 }
 0x562   : > { %883 = vadd.xlane.f32.xlu1 %v882_v61 }
 0x573   : > { %1123 = vrot.lane.b32.xlu1 %v727_v25, %s5617_s14  ;;  %s5637_s14 = smov 72  }
 0x5ef   : > { %v884_v3 = vpop.xlane.xlu1 %883 }
 0x5f0   : > { %4222 = vrcp.f32 %v884_v3 }
 0x5f3   : > { %v1124_v5 = vpop.permute.xlu1 %1123 }
 0x5f4   : > { %3751 = vmatmul.mubr.msk.f32.vlgmr.msra.gmra.mrb[2].mxu0 %vm716_vm5, %v1124_v5 }
 0x5f5   : > { %3759 = vmatpush3.xpose.msk.msra.mxu0 %vm716_vm5, %v1126_v13  ;;  %3760 = vmatprep.mubr.msk.f32.mxu0 %vm4345_vm3, %v4346_v6 }
 0x5f6   : > { %3975 = vmatprep.subr.bf16.mxu0 %v4344_v63 }
 0x5f8   : > { %3761 = vmatmul.mubr.msk.f32.vlgmr.msra.gmra.mrb[4].mxu0 %vm716_vm5, %v1290_v11 }
 0x5f9   : > { %3803 = vmatprep.mubr.msk.f32.mxu0 %vm4345_vm3, %v4346_v6 }
 0x5fa   : > { %v4223_v20 = vpop.eup %4222 }
 0x5fb   : > { %v886_v23 = vmul.f32 %v4223_v20, %v4221_v59 }
 0x5fd   : > { %3736 = vmatmul.mubr.msk.f32.vlgmr.msra.gmra.mrb[4].mxu1 %vm714_vm4, %v886_v23 }
 0x5fe   : > { %3739 = vmatpush3.xpose.msk.msra.mxu1 %vm716_vm5, %v798_v18  ;;  %3740 = vmatprep.mubr.msk.f32.mxu1 %vm4345_vm3, %v4346_v6 }
 0x5ff   : > { %3743 = vmatprep.subr.mxu1 %v4346_v6 }
 0x601   : > { %3741 = vmatmul.mubr.msk.f32.vlgmr.msra.gmra.mrb[6].mxu1 %vm716_vm5, %v965_v1 }
 0x602   : > { %3744 = vmatpush3.msra.mxu1 %v889_v55  ;;  %3745 = vmatprep.mubr.msk.f32.mxu1 %vm4345_vm3, %v4346_v6 }
 0x603   : > { %3753 = vmatprep.subr.mxu1 %v4346_v6 }
 0x6c7   : > { %v1197_v17 = vpop.f32.mrb[2].mxu0 }
 0x6c8   : > { %v1201_v16 = vmul.f32 0.25, %v1197_v17  ;;  %v3752_v24 = vpop.f32.mrb[3].mxu0 }
 0x6ca   : > { %v1202_v25 = vsel %vm714_vm4, %v1201_v16, -inf }
 0x6cb   : > { %1203 = vmax.xlane.f32.xlu0 %v1202_v25  ;;  %v1359_v18 = vpop.f32.mrb[4].mxu0 }
 0x6cc   : > { %v1363_v44 = vmul.f32 0.25, %v1359_v18  ;;  %v3762_v47 = vpop.f32.mrb[5].mxu0 }
 0x6ce   : > { %v1364_v48 = vsel %vm714_vm4, %v1363_v44, -inf }
 0x6cf   : > { %1365 = vmax.xlane.f32.xlu0 %v1364_v48 }
 0x6d0   : > { %v4870_v51 = vpop.f32.mrb[4].mxu1 }
 0x6d1   : > { %v3737_v19 = vpop.f32.mrb[5].mxu1 }
 0x6d4   : > { %v1034_v52 = vpop.f32.mrb[6].mxu1 }
 0x6d5   : > { %v1038_v54 = vmul.f32 0.25, %v1034_v52  ;;  %v3742_v55 = vpop.f32.mrb[7].mxu1 }
 0x6d7   : > { %v1039_v13 = vsel %vm714_vm4, %v1038_v54, -inf }
 0x6d8   : > { %1040 = vmax.xlane.f32.xlu1 %v1039_v13 }
 0x758   : > { %v1204_v59 = vpop.xlane.xlu0 %1203 }
 0x759   : > { %v1205_v61 = vsub.f32 %v1201_v16, %v1204_v59 }
 0x75b   : > { %v1206_v1 = vmul.f32 1.442695, %v1205_v61 }
 0x75c   : > { %v1366_v3 = vpop.xlane.xlu0 %1365 }
 0x75d   : > { %4224 = vpow2.f32 %v1206_v1  ;;  %v1367_v5 = vsub.f32 %v1363_v44, %v1366_v3  ;;  %v1463_v3 = vld [vmem:[%s5607_s3] sm:$0xff] }
 0x75f   : > { %v1368_v17 = vmul.f32 1.442695, %v1367_v5  ;;  %v1464_v5 = vld [vmem:[%s5607_s3 + $0x8] sm:$0xff] }
 0x765   : > { %v1041_v11 = vpop.xlane.xlu1 %1040 }
 0x766   : > { %v1042_v20 = vsub.f32 %v1038_v54, %v1041_v11  ;;  %v1465_v11 = vld [vmem:[%s5607_s3 + $0x10] sm:$0xff] }
 0x767   : > { %v4225_v23 = vpop.eup %4224 }
 0x768   : > { %v1043_v24 = vmul.f32 1.442695, %v1042_v20  ;;  %v1208_v25 = vsel %vm714_vm4, %v4225_v23, 0.0  ;;  %v3948_v20 = vpack.c.bf16 %v1464_v5, %v1463_v3 }
 0x769   : > { %1209 = vadd.xlane.f32.xlu1 %v1208_v25  ;;  %v1468_v25 = vld [vmem:[%s5607_s3 + $0x28] sm:$0xff] }
 0x76a   : > { %4226 = vpow2.f32 %v1043_v24  ;;  %v1467_v24 = vld [vmem:[%s5607_s3 + $0x20] sm:$0xff] }
 0x76b   : > { %4228 = vpow2.f32 %v1368_v17 }
 0x774   : > { %v4227_v18 = vpop.eup %4226 }
 0x775   : > { %v1045_v47 = vsel %vm714_vm4, %v4227_v18, 0.0  ;;  %v4229_v48 = vpop.eup %4228 }
 0x776   : > { %1046 = vadd.xlane.f32.xlu0 %v1045_v47  ;;  %v1370_v16 = vsel %vm714_vm4, %v4229_v48, 0.0  ;;  %v1469_v47 = vld [vmem:[%s5607_s3 + $0x30] sm:$0xff] }
 0x77a   : > { %1213 = vrot.lane.b32.xlu1 %v4725_v43, %s5629_s30  ;;  %1371 = vadd.xlane.f32.xlu0 %v1370_v16 }
 0x7f6   : > { %v1210_v44 = vpop.xlane.xlu1 %1209 }
 0x7fa   : > { %v1214_v59 = vpop.permute.xlu1 %1213 }
 0x803   : > { %v1047_v19 = vpop.xlane.xlu0 %1046 }
 0x804   : > { %4230 = vrcp.f32 %v1047_v19 }
 0x805   : > { %4232 = vrcp.f32 %v1210_v44 }
 0x807   : > { %v1372_v52 = vpop.xlane.xlu0 %1371 }
 0x808   : > { %4234 = vrcp.f32 %v1372_v52 }
 0x80e   : > { %v4231_v54 = vpop.eup %4230 }
 0x80f   : > { %v1049_v55 = vmul.f32 %v4231_v54, %v4227_v18  ;;  %v4233_v13 = vpop.eup %4232  ;;  %v3954_v18 = vpack.c.bf16 %v1468_v25, %v1467_v24  ;;  %v1565_v25 = vld [vmem:[%s5608_s4 + $0x20] sm:$0xff] }
 0x810   : > { %v1212_v61 = vmul.f32 %v4233_v13, %v4225_v23  ;;  %v1466_v23 = vld [vmem:[%s5607_s3 + $0x18] sm:$0xff] }
 0x811   : > { %3746 = vmatmul.mubr.msk.f32.vlgmr.msra.gmra.mrb[8].mxu1 %vm714_vm4, %v1049_v55  ;;  %v3951_v17 = vpack.c.bf16 %v1466_v23, %v1465_v11 }
 0x812   : > { %3754 = vmatpush3.msra.mxu1 %v1214_v59  ;;  %3755 = vmatprep.mubr.msk.f32.mxu1 %vm4345_vm3, %v4346_v6  ;;  %v4235_v43 = vpop.eup %4234 }
 0x813   : > { %3763 = vmatprep.subr.mxu1 %v4346_v6  ;;  %v1374_v1 = vmul.f32 %v4235_v43, %v4229_v48  ;;  %v1470_v48 = vld [vmem:[%s5607_s3 + $0x38] sm:$0xff] }
 0x814   : > { %v3957_v16 = vpack.c.bf16 %v1470_v48, %v1469_v47  ;;  %v1564_v47 = vld [vmem:[%s5608_s4 + $0x18] sm:$0xff]  ;;  %v1563_v48 = vld [vmem:[%s5608_s4 + $0x10] sm:$0xff] }
 0x815   : > { %3756 = vmatmul.mubr.msk.f32.vlgmr.msra.gmra.mrb[10].mxu1 %vm714_vm4, %v1212_v61 }
 0x816   : > { %3764 = vmatpush3.msra.mxu1 %v1214_v59  ;;  %3765 = vmatprep.mubr.msk.f32.mxu1 %vm4345_vm3, %v4346_v6 }
 0x817   : > { %3947 = vmatprep.subr.bf16.mxu1 %v4344_v63 }
 0x819   : > { %3766 = vmatmul.mubr.msk.f32.vlgmr.msra.gmra.mrb[12].mxu1 %vm714_vm4, %v1374_v1 }
 0x81a   : > { %3784 = vmatprep.mubr.msk.f32.mxu1 %vm4345_vm3, %v4346_v6  ;;  %3949 = vmatpush3.bf16.msra.mxu1 %v3948_v20 }
 0x81b   : > { %3950 = vmatprep.subr.bf16.mxu1 %v4344_v63 }
 0x81e   : > { %3952 = vmatpush3.bf16.msra.mxu1 %v3951_v17 }
 0x81f   : > { %3953 = vmatprep.subr.bf16.mxu1 %v4344_v63 }
 0x822   : > { %3955 = vmatpush3.bf16.msra.mxu1 %v3954_v18 }
 0x823   : > { %3956 = vmatprep.subr.bf16.mxu1 %v4344_v63 }
 0x826   : > { %3958 = vmatpush3.bf16.msra.mxu1 %v3957_v16 }
 0x8e4   : > { %v1119_v44 = vpop.f32.mrb[8].mxu1 }
 0x8e5   : > { %1449 = vrot.lane.b32.xlu0 %v1119_v44, %s5629_s30  ;;  %v3747_v19 = vpop.f32.mrb[9].mxu1  ;;  %v1566_v44 = vld [vmem:[%s5608_s4 + $0x28] sm:$0xff]  ;;  %s5638_s30 = smov 112  }
 0x8e6   : > { %v3976_v19 = vpack.c.bf16 %v1566_v44, %v1563_v48  ;;  %v1579_v44 = vld [vmem:[%s5608_s4 + $0x90] sm:$0xff] }
 0x8e8   : > { %v1285_v52 = vpop.f32.mrb[10].mxu1  ;;  %3977 = vmatpush3.bf16.msra.mxu0 %v3976_v19  ;;  %v1582_v19 = vld [vmem:[%s5608_s4 + $0xa8] sm:$0xff] }
 0x8e9   : > { %1453 = vrot.lane.b32.xlu1 %v1285_v52, %s4351_s26  ;;  %v3757_v54 = vpop.f32.mrb[11].mxu1  ;;  %v1568_v52 = vld [vmem:[%s5608_s4 + $0x38] sm:$0xff]  ;;  %3978 = vmatprep.subr.bf16.mxu0 %v4344_v63 }
 0x8ea   : > { %v1571_v54 = vld [vmem:[%s5608_s4 + $0x50] sm:$0xff] }
 0x8ec   : > { %v1444_v55 = vpop.f32.mrb[12].mxu1 }
 0x8ed   : > { %1457 = vrot.lane.b32.xlu1 %v1444_v55, %s5628_s25  ;;  %v3767_v13 = vpop.f32.mrb[13].mxu1  ;;  %v3963_v55 = vpack.c.bf16 %v1571_v54, %v1568_v52  ;;  %v1581_v52 = vld [vmem:[%s5608_s4 + $0xa0] sm:$0xff]  ;;  %v3973_v54 = vpack.c.bf16 %v1582_v19, %v1579_v44  ;;  %v1761_v44 = vld [vmem:[%s5609_s5 + $0x38] sm:$0xff]  ;;  %s5639_s25 = smov 96  }
 0x8ee   : > { %v1567_v13 = vld [vmem:[%s5608_s4 + $0x30] sm:$0xff] }
 0x957   : > { %v1450_v59 = vpop.permute.xlu0 %1449 }
 0x958   : > { %v1460_v43 = vsel %vm716_vm5, %v4870_v51, %v1450_v59  ;;  %v1562_v51 = vld [vmem:[%s5608_s4 + $0x8] sm:$0xff] }
 0x959   : > { %v3959_v18 = vpack.c.bf16 %v1565_v25, %v1562_v51  ;;  %v1570_v59 = vld [vmem:[%s5608_s4 + $0x48] sm:$0xff]  ;;  %v1575_v51 = vld [vmem:[%s5608_s4 + $0x70] sm:$0xff] }
 0x95b   : > { %v1454_v61 = vpop.permute.xlu1 %1453  ;;  %3960 = vmatprep.subr.bf16.mxu1 %v3959_v18  ;;  %v1578_v18 = vld [vmem:[%s5608_s4 + $0x88] sm:$0xff] }
 0x95c   : > { %v1461_v1 = vsel %vm720_vm7, %v1460_v43, %v1454_v61  ;;  %v1569_v61 = vld [vmem:[%s5608_s4 + $0x40] sm:$0xff]  ;;  %v3965_v43 = vpack.c.bf16 %v1570_v59, %v1567_v13  ;;  %v3982_v48 = vpack.c.bf16 %v1578_v18, %v1575_v51 }
 0x95f   : > { %v1458_v3 = vpop.permute.xlu1 %1457 }
 0x960   : > { %v1462_v5 = vsel %vm724_vm9, %v1461_v1, %v1458_v3  ;;  %v1572_v1 = vld [vmem:[%s5608_s4 + $0x58] sm:$0xff] }
 0x961   : > { %3785 = vmatmul.mubr.msk.f32.vlgmr.msra.gmra.mrb[14].mxu1 %vm501_vm2, %v1462_v5  ;;  %v3979_v3 = vpack.c.bf16 %v1572_v1, %v1569_v61  ;;  %v1574_v5 = vld [vmem:[%s5608_s4 + $0x68] sm:$0xff] }
 0x962   : > { %1652 = vmatprep.mubr.f32.mxu1 %v4346_v6 }
 0x963   : > { %3980 = vmatpush3.bf16.msra.mxu0 %v3979_v3  ;;  %v3421_v3 = vld [vmem:[%s5611_s7] ss:$0 sm:$0xff] }
 0x964   : > { %3981 = vmatprep.subr.bf16.mxu0 %v4344_v63 }
 0x967   : > { %3983 = vmatpush3.bf16.msra.mxu0 %v3982_v48 }
 0x968   : > { %3984 = vmatprep.subr.bf16.mxu0 %v4344_v63 }
 0xa34   : > { %v1540_v11 = vpop.f32.mrb[14].mxu1 }
 0xa35   : > { %v4926_v20 = vadd.f32 %v4619_v57, %v1540_v11  ;;  %v3786_v23 = vpop.f32.mrb[15].mxu1  ;;  %v1561_v57 = vld [vmem:[%s5608_s4] sm:$0xff] }
 0xa36   : > { %v3961_v16 = vpack.c.bf16 %v1564_v47, %v1561_v57  ;;  %v1577_v11 = vld [vmem:[%s5608_s4 + $0x80] sm:$0xff]  ;;  %v1580_v57 = vld [vmem:[%s5608_s4 + $0x98] sm:$0xff]  ;;  %v1583_v47 = vld [vmem:[%s5608_s4 + $0xb0] sm:$0xff] }
 0xa37   : > { %v1546_v17 = vmul.f32 %v4926_v20, %v4926_v20  ;;  %v3967_v23 = vpack.c.bf16 %v1577_v11, %v1574_v5 }
 0xa38   : > { %3962 = vmatpush1.bf16.msra.mxu1 %v3961_v16  ;;  %v3971_v16 = vpack.c.bf16 %v1583_v47, %v1580_v57  ;;  %v1758_v57 = vld [vmem:[%s5609_s5 + $0x20] sm:$0xff]  ;;  %v1759_v47 = vld [vmem:[%s5609_s5 + $0x28] sm:$0xff] }
 0xa39   : > { %v1547_v24 = vsel %vm501_vm2, %v1546_v17, 0.0  ;;  %3964 = vmatprep.subr.bf16.mxu1 %v3963_v55  ;;  %v1573_v17 = vld [vmem:[%s5608_s4 + $0x60] sm:$0xff]  ;;  %v1584_v55 = vld [vmem:[%s5608_s4 + $0xb8] sm:$0xff]  ;;  %v3994_v48 = vpack.c.bf16 %v1759_v47, %v1758_v57 }
 0xa3a   : > { %1548 = vadd.xlane.f32.xlu1 %v1547_v24  ;;  %v1576_v24 = vld [vmem:[%s5608_s4 + $0x78] sm:$0xff]  ;;  %v3985_v13 = vpack.c.bf16 %v1584_v55, %v1581_v52  ;;  %v1762_v52 = vld [vmem:[%s5609_s5 + $0x40] sm:$0xff] }
 0xa3b   : > { %v3969_v25 = vpack.c.bf16 %v1576_v24, %v1573_v17  ;;  %v1755_v17 = vld [vmem:[%s5609_s5 + $0x8] sm:$0xff]  ;;  %v1756_v24 = vld [vmem:[%s5609_s5 + $0x10] sm:$0xff]  ;;  %v1774_v47 = vld [vmem:[%s5609_s5 + $0xa0] sm:$0xff] }
 0xa3c   : > { %3966 = vmatpush1.bf16.msra.mxu1 %v3965_v43  ;;  %3986 = vmatpush3.bf16.msra.mxu0 %v3985_v13  ;;  %v1764_v13 = vld [vmem:[%s5609_s5 + $0x50] sm:$0xff] }
 0xa3d   : > { %3968 = vmatprep.subr.bf16.mxu1 %v3967_v23  ;;  %4023 = vmatprep.subr.bf16.mxu0 %v4344_v63  ;;  %v1754_v23 = vld [vmem:[%s5609_s5] sm:$0xff] }
 0xa3e   : > { %v3988_v51 = vpack.c.bf16 %v1755_v17, %v1754_v23  ;;  %v1770_v17 = vld [vmem:[%s5609_s5 + $0x80] sm:$0xff] }
 0xa40   : > { %3970 = vmatpush1.bf16.msra.mxu1 %v3969_v25  ;;  %v1757_v25 = vld [vmem:[%s5609_s5 + $0x18] sm:$0xff] }
 0xa41   : > { %3972 = vmatprep.subr.bf16.mxu1 %v3971_v16  ;;  %v3991_v18 = vpack.c.bf16 %v1757_v25, %v1756_v24  ;;  %v1760_v16 = vld [vmem:[%s5609_s5 + $0x30] sm:$0xff]  ;;  %v1771_v24 = vld [vmem:[%s5609_s5 + $0x88] sm:$0xff] }
 0xa42   : > { %v3997_v19 = vpack.c.bf16 %v1761_v44, %v1760_v16  ;;  %v1772_v25 = vld [vmem:[%s5609_s5 + $0x90] sm:$0xff] }
 0xa43   : > { %v1776_v44 = vld [vmem:[%s5609_s5 + $0xb0] sm:$0xff] }
 0xa44   : > { %3974 = vmatpush1.bf16.msra.mxu1 %v3973_v54  ;;  %v1763_v54 = vld [vmem:[%s5609_s5 + $0x48] sm:$0xff] }
 0xa45   : > { %3987 = vmatprep.subr.bf16.mxu1 %v4344_v63  ;;  %v4000_v55 = vpack.c.bf16 %v1763_v54, %v1762_v52 }
 0xac7   : > { %v1549_v59 = vpop.xlane.xlu1 %1548 }
 0xac8   : > { %v1550_v61 = vmul.f32 0.015625, %v1549_v59  ;;  %v1765_v59 = vld [vmem:[%s5609_s5 + $0x58] sm:$0xff] }
 0xaca   : > { %v1551_v43 = vadd.f32 1e-05, %v1550_v61  ;;  %v4003_v61 = vpack.c.bf16 %v1765_v59, %v1764_v13 }
 0xacc   : > { %4236 = vrsqrt.f32 %v1551_v43  ;;  %v1766_v43 = vld [vmem:[%s5609_s5 + $0x60] sm:$0xff] }
 0xad6   : > { %v4237_v1 = vpop.eup %4236 }
 0xad7   : > { %v1553_v5 = vmul.f32 %v4237_v1, %v4926_v20  ;;  %v1767_v1 = vld [vmem:[%s5609_s5 + $0x68] sm:$0xff] }
 0xad9   : > { %v1560_v11 = vmul.f32 %v3421_v3, %v1553_v5  ;;  %v4006_v3 = vpack.c.bf16 %v1767_v1, %v1766_v43  ;;  %v1768_v5 = vld [vmem:[%s5609_s5 + $0x70] sm:$0xff] }
 0xadb   : > { %3422 = vmatmul.mubr.msk.f32.vlgmr.msra.gmra.mrb[16].mxu1 %vm501_vm2, %v1560_v11  ;;  %3804 = vmatmul.mubr.msk.f32.vlgmr.msra.gmra.mrb[6].mxu0 %vm501_vm2, %v1560_v11  ;;  %v1769_v11 = vld [vmem:[%s5609_s5 + $0x78] sm:$0xff] }
 0xadc   : > { %3822 = vmatprep.mubr.msk.f32.mxu0 %vm4345_vm3, %v4346_v6  ;;  %3989 = vmatpush1.bf16.msra.mxu1 %v3988_v51  ;;  %v4009_v23 = vpack.c.bf16 %v1769_v11, %v1768_v5  ;;  %v4012_v51 = vpack.c.bf16 %v1771_v24, %v1770_v17 }
 0xadd   : > { %3990 = vmatprep.subr.bf16.mxu1 %v4344_v63 }
 0xae0   : > { %3992 = vmatpush1.bf16.msra.mxu1 %v3991_v18  ;;  %v1773_v18 = vld [vmem:[%s5609_s5 + $0x98] sm:$0xff] }
 0xae1   : > { %3993 = vmatprep.subr.bf16.mxu1 %v4344_v63  ;;  %v4015_v57 = vpack.c.bf16 %v1773_v18, %v1772_v25 }
 0xae4   : > { %3995 = vmatpush1.bf16.msra.mxu1 %v3994_v48  ;;  %v1775_v48 = vld [vmem:[%s5609_s5 + $0xa8] sm:$0xff] }
 0xae5   : > { %3996 = vmatprep.subr.bf16.mxu1 %v4344_v63  ;;  %v4018_v16 = vpack.c.bf16 %v1775_v48, %v1774_v47 }
 0xae8   : > { %3998 = vmatpush1.bf16.msra.mxu1 %v3997_v19  ;;  %v1777_v19 = vld [vmem:[%s5609_s5 + $0xb8] sm:$0xff] }
 0xae9   : > { %3999 = vmatprep.subr.bf16.mxu1 %v4344_v63  ;;  %v4021_v52 = vpack.c.bf16 %v1777_v19, %v1776_v44 }
 0xaec   : > { %4001 = vmatpush1.bf16.msra.mxu1 %v4000_v55 }
 0xaed   : > { %4002 = vmatprep.subr.bf16.mxu1 %v4344_v63 }
 0xaf0   : > { %4004 = vmatpush1.bf16.msra.mxu1 %v4003_v61 }
 0xaf1   : > { %4005 = vmatprep.subr.bf16.mxu1 %v4344_v63 }
 0xaf4   : > { %4007 = vmatpush1.bf16.msra.mxu1 %v4006_v3 }
 0xaf5   : > { %4008 = vmatprep.subr.bf16.mxu1 %v4344_v63 }
 0xaf8   : > { %4010 = vmatpush1.bf16.msra.mxu1 %v4009_v23 }
 0xaf9   : > { %4011 = vmatprep.subr.bf16.mxu1 %v4344_v63 }
 0xafc   : > { %4013 = vmatpush1.bf16.msra.mxu1 %v4012_v51 }
 0xafd   : > { %4014 = vmatprep.subr.bf16.mxu1 %v4344_v63 }
 0xb00   : > { %4016 = vmatpush1.bf16.msra.mxu1 %v4015_v57 }
 0xb01   : > { %4017 = vmatprep.subr.bf16.mxu1 %v4344_v63 }
 0xb04   : > { %4019 = vmatpush1.bf16.msra.mxu1 %v4018_v16 }
 0xb05   : > { %4020 = vmatprep.subr.bf16.mxu1 %v4344_v63 }
 0xb08   : > { %4022 = vmatpush1.bf16.msra.mxu1 %v4021_v52 }
 0xb09   : > { %3850 = vmatprep.subr.mxu1 %v4346_v6 }
 0xbae   : > { %v1654_v54 = vpop.f32.mrb[16].mxu1  ;;  %v1725_v55 = vpop.f32.mrb[6].mxu0 }
 0xbaf   : > { %v1656_v13 = vpop.f32.mrb[17].mxu1  ;;  %v3805_v59 = vpop.f32.mrb[7].mxu0  ;;  %v3424_v43 = vmul.f32 -1.442695, %v1654_v54 }
 0xbb0   : > { %1745 = vrot.lane.b32.xlu0 %v1656_v13, %s5634_s29  ;;  %v3425_v61 = vmul.f32 -1.442695, %v1656_v13 }
 0xbb2   : > { %4238 = vpow2.f32 %v3425_v61  ;;  %v3432_v61 = vld [vmem:[%s5606_s2 + $0x58] sm:$0xff] }
 0xbb3   : > { %4240 = vpow2.f32 %v3424_v43 }
 0xbb4   : > { %1747 = vrot.lane.b32.xlu0 %v1725_v55, %s5634_s29  ;;  %v3429_v55 = vld [vmem:[%s5606_s2 + $0x40] sm:$0xff] }
 0xbbc   : > { %v4239_v1 = vpop.eup %4238 }
 0xbbd   : > { %v4241_v3 = vpop.eup %4240  ;;  %v1736_v5 = vadd.f32 1.0, %v4239_v1  ;;  %v3433_v1 = vld [vmem:[%s5606_s2 + $0x60] sm:$0xff] }
 0xbbe   : > { %v1735_v11 = vadd.f32 1.0, %v4241_v3  ;;  %v3434_v3 = vld [vmem:[%s5606_s2 + $0x68] sm:$0xff] }
 0xbbf   : > { %4242 = vrcp.f32 %v1736_v5  ;;  %v4030_v5 = vpack.c.bf16 %v3434_v3, %v3433_v1 }
 0xbc0   : > { %4244 = vrcp.f32 %v1735_v11  ;;  %v3435_v11 = vld [vmem:[%s5606_s2 + $0x70] sm:$0xff] }
 0xbc9   : > { %v4243_v23 = vpop.eup %4242 }
 0xbca   : > { %v4245_v24 = vpop.eup %4244  ;;  %v1742_v51 = vmul.f32 %v4243_v23, %v1656_v13  ;;  %v3430_v13 = vld [vmem:[%s5606_s2 + $0x48] sm:$0xff]  ;;  %v3436_v23 = vld [vmem:[%s5606_s2 + $0x78] sm:$0xff] }
 0xbcb   : > { %v1741_v25 = vmul.f32 %v4245_v24, %v1654_v54  ;;  %v4024_v59 = vpack.c.bf16 %v3430_v13, %v3429_v55 }
 0xbcd   : > { %4025 = vmatpush3.bf16.msra.mxu0 %v4024_v59 }
 0xbce   : > { %4026 = vmatprep.subr.bf16.mxu0 %v4344_v63 }
 0xc22   : > { %v1746_v17 = vpop.permute.xlu0 %1745 }
 0xc26   : > { %v1748_v18 = vpop.permute.xlu0 %1747 }
 0xc27   : > { %v1749_v57 = vsel %vm501_vm2, %v1746_v17, %v1748_v18  ;;  %v1753_v47 = vmul.f32 %v1748_v18, %v1742_v51  ;;  %v4033_v17 = vpack.c.bf16 %v3436_v23, %v3435_v11 }
 0xc28   : > { %v1752_v48 = vmul.f32 %v1749_v57, %v1741_v25  ;;  %v3428_v57 = vld [vmem:[%s5610_s6 + $0x1] ss:$0 sm:$0xff] }
 0xc29   : > { %3426 = vmatprep.mubr.msk.f32.mxu1 %vm501_vm2, %v1753_v47 }
 0xc2a   : > { %1846 = vmatmul.mubr.f32.vlgmr.msra.gmra.mrb[18].mxu1 %v1752_v48 }
 0xc2b   : > { %3852 = vmatprep.mubr.msk.f32.mxu1 %vm4345_vm3, %v4346_v6 }
 0xcfd   : > { %v1847_v16 = vpop.f32.mrb[18].mxu1 }
 0xcfe   : > { %v5107_v44 = vadd.f32 %v1847_v16, %v4926_v20  ;;  %v1849_v19 = vpop.f32.mrb[19].mxu1  ;;  %v3431_v20 = vld [vmem:[%s5606_s2 + $0x50] sm:$0xff] }
 0xcff   : > { %v4027_v43 = vpack.c.bf16 %v3432_v61, %v3431_v20 }
 0xd00   : > { %v1854_v52 = vmul.f32 %v5107_v44, %v5107_v44 }
 0xd01   : > { %4028 = vmatpush3.bf16.msra.mxu0 %v4027_v43 }
 0xd02   : > { %v1855_v54 = vsel %vm501_vm2, %v1854_v52, 0.0  ;;  %4029 = vmatprep.subr.bf16.mxu0 %v4344_v63 }
 0xd03   : > { %1856 = vadd.xlane.f32.xlu0 %v1855_v54 }
 0xd05   : > { %4031 = vmatpush3.bf16.msra.mxu0 %v4030_v5 }
 0xd06   : > { %4032 = vmatprep.subr.bf16.mxu0 %v4344_v63 }
 0xd09   : > { %4034 = vmatpush3.bf16.msra.mxu0 %v4033_v17 }
 0xd0a   : > { %3825 = vmatprep.subr.mxu0 %v4346_v6 }
 0xd90   : > { %v1857_v24 = vpop.xlane.xlu0 %1856 }
 0xd91   : > { %v1858_v51 = vmul.f32 0.015625, %v1857_v24 }
 0xd93   : > { %v1859_v25 = vadd.f32 1e-05, %v1858_v51 }
 0xd95   : > { %4246 = vrsqrt.f32 %v1859_v25 }
 0xd9f   : > { %v4247_v18 = vpop.eup %4246 }
 0xda0   : > { %v1861_v47 = vmul.f32 %v4247_v18, %v5107_v44 }
 0xda2   : > { %v1868_v48 = vmul.f32 %v3428_v57, %v1861_v47 }
 0xda4   : > { %3823 = vmatmul.mubr.msk.f32.vlgmr.msra.gmra.mrb[8].mxu0 %vm501_vm2, %v1868_v48 }
 0xda5   : > { %3827 = vmatprep.mubr.msk.f32.mxu0 %vm4345_vm3, %v4346_v6 }
 0xe77   : > { %v5147_v16 = vpop.f32.mrb[8].mxu0 }
 0xe78   : > { %v3824_v19 = vpop.f32.mrb[9].mxu0  ;;  %v2031_v52 = vmul.f32 %v5147_v16, %v4705_v29  ;;  %v1959_v54 = vmul.f32 %v5147_v16, %v4703_v26  ;;  %v2052_v55 = vmul.f32 %v5147_v16, %v4713_v35  ;;  %v2038_v13 = vmul.f32 %v5147_v16, %v4707_v30 }
 0xe79   : > { %v2001_v29 = vmul.f32 %v5147_v16, %v4717_v37  ;;  %v1973_v26 = vmul.f32 %v5147_v16, %v4709_v31  ;;  %v1966_v35 = vmul.f32 %v5147_v16, %v4733_v50  ;;  %v2045_v30 = vmul.f32 %v5147_v16, %v4711_v32 }
 0xe7a   : > { %2033 = vrot.lane.b32.xlu0 %v2031_v52, %s5635_s24  ;;  %1961 = vrot.lane.b32.xlu1 %v1959_v54, %s5635_s24  ;;  %v1980_v37 = vmul.f32 %v5147_v16, %v4764_v0  ;;  %v1987_v31 = vmul.f32 %v5147_v16, %v4715_v36  ;;  %v1952_v50 = vmul.f32 %v5147_v16, %v4719_v38  ;;  %v4276_v0 = vld [vmem:[%s5614_s10] sm:$0xff] }
 0xe7b   : > { %v1994_v32 = vmul.f32 %v5147_v16, %v4770_v2  ;;  %v1958_v36 = vmul.f32 %v4276_v0, %v5147_v16  ;;  %v2030_v43 = vmul.f32 %v5147_v16, %v4721_v41  ;;  %v2037_v38 = vmul.f32 %v5147_v16, %v4723_v42 }
 0xe7c   : > { %v1972_v5 = vmul.f32 %v5147_v16, %v4739_v53  ;;  %v2044_v41 = vmul.f32 %v5147_v16, %v4751_v58  ;;  %v2051_v51 = vmul.f32 %v5147_v16, %v4747_v56  ;;  %v1986_v25 = vmul.f32 %v5147_v16, %v4758_v60 }
 0xe7d   : > { %v2000_v48 = vmul.f32 %v5147_v16, %v4806_v62 }
 0xe7e   : > { %2054 = vrot.lane.b32.xlu0 %v2052_v55, %s5635_s24  ;;  %2040 = vrot.lane.b32.xlu1 %v2038_v13, %s5635_s24  ;;  %v4277_v13 = vld [vmem:[%s5613_s9] sm:$0xff] }
 0xe82   : > { %2003 = vrot.lane.b32.xlu0 %v2001_v29, %s5635_s24  ;;  %1975 = vrot.lane.b32.xlu1 %v1973_v26, %s5635_s24  ;;  %v1951_v29 = vmul.f32 %v4277_v13, %v5147_v16  ;;  %v1965_v26 = vmul.f32 %v5147_v16, %v4813_v10 }
 0xe86   : > { %1968 = vrot.lane.b32.xlu0 %v1966_v35, %s5635_s24  ;;  %2047 = vrot.lane.b32.xlu1 %v2045_v30, %s5635_s24 }
 0xe8a   : > { %1982 = vrot.lane.b32.xlu0 %v1980_v37, %s5635_s24  ;;  %1989 = vrot.lane.b32.xlu1 %v1987_v31, %s5635_s24 }
 0xe8e   : > { %1954 = vrot.lane.b32.xlu1 %v1952_v50, %s5635_s24  ;;  %v1979_v50 = vmul.f32 %v5147_v16, %v4811_v7 }
 0xe92   : > { %1996 = vrot.lane.b32.xlu1 %v1994_v32, %s5635_s24  ;;  %s5640_s24 = smov 80  }
 0xeec   : > { %v1962_v59 = vpop.permute.xlu1 %1961  ;;  %v2034_v61 = vpop.permute.xlu0 %2033 }
 0xeed   : > { %v1964_v20 = vadd.f32 %v1962_v59, %v1958_v36  ;;  %v2036_v1 = vsub.f32 %v2030_v43, %v2034_v61  ;;  %v1993_v61 = vmul.f32 %v5147_v16, %v4815_v12 }
 0xeef   : > { %2008 = vrot.lane.b32.xlu1 %v1964_v20, %s5636_s12 }
 0xef0   : > { %v2041_v2 = vpop.permute.xlu1 %2040  ;;  %v2055_v17 = vpop.permute.xlu0 %2054 }
 0xef1   : > { %v2043_v3 = vadd.f32 %v2041_v2, %v2037_v38  ;;  %v2057_v53 = vadd.f32 %v2055_v17, %v2051_v51 }
 0xef3   : > { %2063 = vrot.lane.b32.xlu0 %v2043_v3, %s5637_s14  ;;  %2059 = vrot.lane.b32.xlu1 %v2036_v1, %s5634_s29 }
 0xef4   : > { %v1976_v11 = vpop.permute.xlu1 %1975  ;;  %v2004_v47 = vpop.permute.xlu0 %2003 }
 0xef5   : > { %v1978_v23 = vadd.f32 %v1976_v11, %v1972_v5  ;;  %v2006_v58 = vadd.f32 %v2004_v47, %v2000_v48 }
 0xef7   : > { %2012 = vrot.lane.b32.xlu1 %v1978_v23, %s5636_s12 }
 0xef8   : > { %v2048_v24 = vpop.permute.xlu1 %2047  ;;  %v1969_v52 = vpop.permute.xlu0 %1968 }
 0xef9   : > { %v2050_v42 = vsub.f32 %v2044_v41, %v2048_v24  ;;  %v1971_v37 = vsub.f32 %v1965_v26, %v1969_v52 }
 0xefb   : > { %2067 = vrot.lane.b32.xlu0 %v2050_v42, %s5634_s29 }
 0xefc   : > { %v1990_v18 = vpop.permute.xlu1 %1989  ;;  %v1983_v55 = vpop.permute.xlu0 %1982 }
 0xefd   : > { %v1992_v57 = vadd.f32 %v1990_v18, %v1986_v25  ;;  %v1985_v59 = vsub.f32 %v1979_v50, %v1983_v55 }
 0xeff   : > { %2071 = vrot.lane.b32.xlu0 %v2057_v53, %s5637_s14  ;;  %2016 = vrot.lane.b32.xlu1 %v1992_v57, %s5636_s12 }
 0xf00   : > { %v1955_v56 = vpop.permute.xlu1 %1954 }
 0xf01   : > { %v1957_v62 = vsub.f32 %v1951_v29, %v1955_v56 }
 0xf03   : > { %2020 = vrot.lane.b32.xlu0 %v2006_v58, %s5636_s12  ;;  %s3553_s12 = sshll.u32 %s4443_s21, 8  ;;  %s4361_s21 = smov [#allocation2]  }
 0xf04   : > { %v1997_v19 = vpop.permute.xlu1 %1996  ;;  %s5564_s16 = scalar_lea.hbm %s5615_s11, %s3553_s12 }
 0xf05   : > { %v1999_v3 = vsub.f32 %v1993_v61, %v1997_v19 }
 0xf61   : > { %v2009_v54 = vpop.permute.xlu1 %2008 }
 0xf62   : > { %v2023_v30 = vsel %vm714_vm4, %v1957_v62, %v2009_v54 }
 0xf63   : > { %v2024_v32 = vsel %vm716_vm5, %v2023_v30, %v1971_v37 }
 0xf65   : > { %v2060_v60 = vpop.permute.xlu1 %2059  ;;  %v2064_v35 = vpop.permute.xlu0 %2063 }
 0xf66   : > { %v2074_v20 = vsel %vm714_vm4, %v2060_v60, %v2064_v35 }
 0xf69   : > { %v2013_v31 = vpop.permute.xlu1 %2012 }
 0xf6a   : > { %v2025_v36 = vsel %vm718_vm6, %v2024_v32, %v2013_v31 }
 0xf6b   : > { %v2026_v2 = vsel %vm720_vm7, %v2025_v36, %v1985_v59 }
 0xf6d   : > { %v2068_v0 = vpop.permute.xlu0 %2067 }
 0xf6e   : > { %v2075_v10 = vsel %vm716_vm5, %v2074_v20, %v2068_v0 }
 0xf71   : > { %v2072_v43 = vpop.permute.xlu0 %2071  ;;  %v2017_v38 = vpop.permute.xlu1 %2016 }
 0xf72   : > { %v2076_v1 = vsel %vm718_vm6, %v2075_v10, %v2072_v43  ;;  %v2027_v7 = vsel %vm722_vm8, %v2026_v2, %v2017_v38 }
 0xf73   : > { %3826 = vmatpush3.xpose.msk.msra.mxu0 %vm716_vm5, %v2076_v1  ;;  %v2028_v11 = vsel %vm724_vm9, %v2027_v7, %v1999_v3 }
 0xf74   : > { %3830 = vmatprep.subr.mxu0 %v4346_v6 }
 0xf75   : > { %v2021_v5 = vpop.permute.xlu0 %2020 }
 0xf76   : > { %v2029_v12 = vsel %vm726_vm10, %v2028_v11, %v2021_v5 }
 0xf77   : > { %3828 = vmatmul.mubr.msk.f32.vlgmr.msra.gmra.mrb[10].mxu0 %vm716_vm5, %v2029_v12 }
 0xf78   : > { %3832 = vmatprep.mubr.msk.f32.mxu0 %vm4345_vm3, %v4346_v6 }
0x104a   : > { %v2149_v23 = vpop.f32.mrb[10].mxu0 }
0x104b   : > { %v2153_v41 = vmul.f32 0.25, %v2149_v23  ;;  %v3829_v17 = vpop.f32.mrb[11].mxu0 }
0x104d   : > { %v2154_v24 = vsel %vm714_vm4, %v2153_v41, -inf }
0x104e   : > { %2155 = vmax.xlane.f32.xlu1 %v2154_v24 }
0x105f   : > { %2242 = vrot.lane.b32.xlu1 %v2029_v12, %s5638_s30 }
0x10db   : > { %v2156_v42 = vpop.xlane.xlu1 %2155 }
0x10dc   : > { %v2157_v51 = vsub.f32 %v2153_v41, %v2156_v42 }
0x10de   : > { %v2158_v25 = vmul.f32 1.442695, %v2157_v51 }
0x10df   : > { %v2243_v56 = vpop.permute.xlu1 %2242 }
0x10e0   : > { %4248 = vpow2.f32 %v2158_v25 }
0x10ea   : > { %v4249_v18 = vpop.eup %4248 }
0x10eb   : > { %v2160_v53 = vsel %vm714_vm4, %v4249_v18, 0.0 }
0x10ec   : > { %2161 = vadd.xlane.f32.xlu0 %v2160_v53 }
0x1102   : > { %2166 = vrot.lane.b32.xlu0 %v5147_v16, %s4351_s26 }
0x1179   : > { %v2162_v57 = vpop.xlane.xlu0 %2161 }
0x117a   : > { %4250 = vrcp.f32 %v2162_v57 }
0x117d   : > { %v2167_v47 = vpop.permute.xlu0 %2166 }
0x117e   : > { %3831 = vmatpush3.msra.mxu0 %v2167_v47 }
0x117f   : > { %3835 = vmatprep.subr.mxu0 %v4346_v6 }
0x1184   : > { %v4251_v48 = vpop.eup %4250 }
0x1185   : > { %v2164_v58 = vmul.f32 %v4251_v48, %v4249_v18 }
0x1187   : > { %3833 = vmatmul.mubr.msk.f32.vlgmr.msra.gmra.mrb[12].mxu0 %vm714_vm4, %v2164_v58 }
0x1188   : > { %3836 = vmatpush3.xpose.msk.msra.mxu0 %vm716_vm5, %v2076_v1  ;;  %3837 = vmatprep.mubr.msk.f32.mxu0 %vm4345_vm3, %v4346_v6 }
0x1189   : > { %3840 = vmatprep.subr.mxu0 %v4346_v6 }
0x118b   : > { %3838 = vmatmul.mubr.msk.f32.vlgmr.msra.gmra.mrb[14].mxu0 %vm716_vm5, %v2243_v56 }
0x118c   : > { %3841 = vmatpush3.msra.mxu0 %v2167_v47  ;;  %3842 = vmatprep.mubr.msk.f32.mxu0 %vm4345_vm3, %v4346_v6 }
0x118d   : > { %3845 = vmatprep.subr.mxu0 %v4346_v6 }
0x125a   : > { %v5251_v19 = vpop.f32.mrb[12].mxu0 }
0x125b   : > { %v3834_v52 = vpop.f32.mrb[13].mxu0 }
0x125c   : > { %v3451_v52 = vld [vmem:[%s5607_s3 + $0x48] sm:$0xff] }
0x125e   : > { %v2312_v54 = vpop.f32.mrb[14].mxu0 }
0x125f   : > { %v2316_v55 = vmul.f32 0.25, %v2312_v54  ;;  %v3839_v60 = vpop.f32.mrb[15].mxu0  ;;  %v3452_v54 = vld [vmem:[%s5607_s3 + $0x50] sm:$0xff] }
0x1260   : > { %v3453_v60 = vld [vmem:[%s5607_s3 + $0x58] sm:$0xff] }
0x1261   : > { %v2317_v13 = vsel %vm714_vm4, %v2316_v55, -inf }
0x1262   : > { %2318 = vmax.xlane.f32.xlu1 %v2317_v13  ;;  %v4039_v13 = vpack.c.bf16 %v3453_v60, %v3452_v54  ;;  %v3476_v54 = vld [vmem:[%s5608_s4 + $0x138] sm:$0xff] }
0x1273   : > { %2401 = vrot.lane.b32.xlu1 %v2029_v12, %s5639_s25  ;;  %s4282_s25 = sshll.u32 %s4361_s21, 4  ;;  %s4283_s25 = int_to_ptr.vmem [resolvable:$false] %s4282_s25 }
0x1277   : > { %2567 = vrot.lane.b32.xlu1 %v2029_v12, %s5640_s24  ;;  %s5642_s24 = smov 48  }
0x12ef   : > { %v2319_v29 = vpop.xlane.xlu1 %2318 }
0x12f0   : > { %v2320_v62 = vsub.f32 %v2316_v55, %v2319_v29  ;;  %v3454_v29 = vld [vmem:[%s5607_s3 + $0x60] sm:$0xff] }
0x12f2   : > { %v2321_v26 = vmul.f32 1.442695, %v2320_v62  ;;  %v3455_v62 = vld [vmem:[%s5607_s3 + $0x68] sm:$0xff] }
0x12f3   : > { %v2402_v0 = vpop.permute.xlu1 %2401 }
0x12f4   : > { %4252 = vpow2.f32 %v2321_v26  ;;  %v4042_v26 = vpack.c.bf16 %v3455_v62, %v3454_v29  ;;  %v3480_v29 = vld [vmem:[%s5608_s4 + $0x158] sm:$0xff]  ;;  %v3483_v62 = vld [vmem:[%s5608_s4 + $0x170] sm:$0xff] }
0x12f7   : > { %v2568_v36 = vpop.permute.xlu1 %2567 }
0x12fe   : > { %v4253_v35 = vpop.eup %4252 }
0x12ff   : > { %v2323_v30 = vsel %vm714_vm4, %v4253_v35, 0.0 }
0x1300   : > { %2324 = vadd.xlane.f32.xlu0 %v2323_v30  ;;  %v3457_v30 = vld [vmem:[%s5607_s3 + $0x78] sm:$0xff] }
0x1316   : > { %2403 = vrot.lane.b32.xlu0 %v2076_v1, %s5638_s30 }
0x138d   : > { %v2325_v37 = vpop.xlane.xlu0 %2324 }
0x138e   : > { %4254 = vrcp.f32 %v2325_v37 }
0x1391   : > { %v2404_v32 = vpop.permute.xlu0 %2403 }
0x1398   : > { %v4255_v31 = vpop.eup %4254 }
0x1399   : > { %v2327_v50 = vmul.f32 %v4255_v31, %v4253_v35  ;;  %v3456_v35 = vld [vmem:[%s5607_s3 + $0x70] sm:$0xff] }
0x139a   : > { %v4045_v37 = vpack.c.bf16 %v3457_v30, %v3456_v35  ;;  %v4059_v35 = vpack.c.bf16 %v3483_v62, %v3480_v29  ;;  %v3479_v30 = vld [vmem:[%s5608_s4 + $0x150] sm:$0xff]  ;;  %v3509_v62 = vld [vmem:[%s5609_s5 + $0x160] sm:$0xff] }
0x139b   : > { %3843 = vmatmul.mubr.msk.f32.vlgmr.msra.gmra.mrb[16].mxu0 %vm714_vm4, %v2327_v50 }
0x139c   : > { %3846 = vmatpush3.xpose.msk.msra.mxu0 %vm716_vm5, %v2404_v32  ;;  %3847 = vmatprep.mubr.msk.f32.mxu0 %vm4345_vm3, %v4346_v6 }
0x139d   : > { %3855 = vmatprep.subr.mxu0 %v4346_v6 }
0x139f   : > { %3848 = vmatmul.mubr.msk.f32.vlgmr.msra.gmra.mrb[18].mxu0 %vm716_vm5, %v2402_v0 }
0x13a0   : > { %3856 = vmatpush3.xpose.msk.msra.mxu0 %vm716_vm5, %v2404_v32  ;;  %3857 = vmatprep.mubr.msk.f32.mxu0 %vm4345_vm3, %v4346_v6 }
0x13a1   : > { %4035 = vmatprep.subr.bf16.mxu0 %v4344_v63 }
0x13a3   : > { %3858 = vmatmul.mubr.msk.f32.vlgmr.msra.gmra.mrb[20].mxu0 %vm716_vm5, %v2568_v36 }
0x13a4   : > { %3881 = vmatprep.mubr.msk.f32.mxu0 %vm4345_vm3, %v4346_v6 }
0x146e   : > { %v2397_v59 = vpop.f32.mrb[16].mxu0 }
0x146f   : > { %v3844_v20 = vpop.f32.mrb[17].mxu0 }
0x1472   : > { %v2475_v61 = vpop.f32.mrb[18].mxu0 }
0x1473   : > { %v2479_v10 = vmul.f32 0.25, %v2475_v61  ;;  %v3849_v43 = vpop.f32.mrb[19].mxu0 }
0x1475   : > { %v2480_v38 = vsel %vm714_vm4, %v2479_v10, -inf }
0x1476   : > { %2481 = vmax.xlane.f32.xlu0 %v2480_v38  ;;  %v2637_v2 = vpop.f32.mrb[20].mxu0 }
0x1477   : > { %v2641_v1 = vmul.f32 0.25, %v2637_v2  ;;  %v3859_v7 = vpop.f32.mrb[21].mxu0 }
0x1479   : > { %v2642_v3 = vsel %vm714_vm4, %v2641_v1, -inf }
0x147a   : > { %2643 = vmax.xlane.f32.xlu1 %v2642_v3  ;;  %v3462_v3 = vld [vmem:[%s5608_s4 + $0xc8] sm:$0xff] }
0x148b   : > { %2727 = vrot.lane.b32.xlu1 %v2397_v59, %s5641_s22 }
0x1503   : > { %v2482_v5 = vpop.xlane.xlu0 %2481 }
0x1504   : > { %v2483_v11 = vsub.f32 %v2479_v10, %v2482_v5  ;;  %v3465_v5 = vld [vmem:[%s5608_s4 + $0xe0] sm:$0xff] }
0x1506   : > { %v2484_v12 = vmul.f32 1.442695, %v2483_v11  ;;  %v3464_v11 = vld [vmem:[%s5608_s4 + $0xd8] sm:$0xff] }
0x1507   : > { %v2644_v23 = vpop.xlane.xlu1 %2643 }
0x1508   : > { %4256 = vpow2.f32 %v2484_v12  ;;  %v2645_v41 = vsub.f32 %v2641_v1, %v2644_v23  ;;  %v3463_v12 = vld [vmem:[%s5608_s4 + $0xd0] sm:$0xff] }
0x150a   : > { %v2646_v17 = vmul.f32 1.442695, %v2645_v41  ;;  %v3466_v41 = vld [vmem:[%s5608_s4 + $0xe8] sm:$0xff] }
0x150b   : > { %v2728_v36 = vpop.permute.xlu1 %2727 }
0x150c   : > { %4258 = vpow2.f32 %v2646_v17  ;;  %v2738_v20 = vsel %vm716_vm5, %v5251_v19, %v2728_v36  ;;  %v4064_v17 = vpack.c.bf16 %v3466_v41, %v3463_v12  ;;  %v3496_v41 = vld [vmem:[%s5609_s5 + $0xf8] sm:$0xff] }
0x1512   : > { %v4257_v24 = vpop.eup %4256 }
0x1513   : > { %v2486_v42 = vsel %vm714_vm4, %v4257_v24, 0.0 }
0x1514   : > { %2487 = vadd.xlane.f32.xlu0 %v2486_v42  ;;  %v3471_v42 = vld [vmem:[%s5608_s4 + $0x110] sm:$0xff] }
0x1516   : > { %v4259_v51 = vpop.eup %4258 }
0x1517   : > { %v2648_v25 = vsel %vm714_vm4, %v4259_v51, 0.0 }
0x1518   : > { %2649 = vadd.xlane.f32.xlu0 %v2648_v25  ;;  %v3467_v25 = vld [vmem:[%s5608_s4 + $0xf0] sm:$0xff] }
0x152e   : > { %2491 = vrot.lane.b32.xlu0 %v5147_v16, %s5641_s22  ;;  %v3450_v16 = vld [vmem:[%s5607_s3 + $0x40] sm:$0xff] }
0x152f   : > { %v4036_v55 = vpack.c.bf16 %v3451_v52, %v3450_v16  ;;  %v3473_v52 = vld [vmem:[%s5608_s4 + $0x120] sm:$0xff] }
0x1530   : > { %v4057_v60 = vpack.c.bf16 %v3476_v54, %v3473_v52  ;;  %v3505_v52 = vld [vmem:[%s5609_s5 + $0x140] sm:$0xff]  ;;  %v3506_v54 = vld [vmem:[%s5609_s5 + $0x148] sm:$0xff] }
0x1531   : > { %4037 = vmatpush3.bf16.msra.mxu0 %v4036_v55  ;;  %v3475_v55 = vld [vmem:[%s5608_s4 + $0x130] sm:$0xff] }
0x1532   : > { %4038 = vmatprep.subr.bf16.mxu0 %v4344_v63 }
0x1535   : > { %4040 = vmatpush3.bf16.msra.mxu0 %v4039_v13  ;;  %v3478_v13 = vld [vmem:[%s5608_s4 + $0x148] sm:$0xff] }
0x1536   : > { %4041 = vmatprep.subr.bf16.mxu0 %v4344_v63 }
0x1539   : > { %4043 = vmatpush3.bf16.msra.mxu0 %v4042_v26  ;;  %v4070_v26 = vpack.c.bf16 %v3478_v13, %v3475_v55  ;;  %v4100_v55 = vpack.c.bf16 %v3506_v54, %v3505_v52  ;;  %v3508_v13 = vld [vmem:[%s5609_s5 + $0x158] sm:$0xff] }
0x153a   : > { %4044 = vmatprep.subr.bf16.mxu0 %v4344_v63 }
0x153d   : > { %4046 = vmatpush3.bf16.msra.mxu0 %v4045_v37  ;;  %v3482_v37 = vld [vmem:[%s5608_s4 + $0x168] sm:$0xff] }
0x153e   : > { %4063 = vmatprep.subr.bf16.mxu0 %v4344_v63 }
0x15a1   : > { %v2488_v18 = vpop.xlane.xlu0 %2487 }
0x15a2   : > { %4260 = vrcp.f32 %v2488_v18  ;;  %v3470_v18 = vld [vmem:[%s5608_s4 + $0x108] sm:$0xff] }
0x15a5   : > { %v2650_v53 = vpop.xlane.xlu0 %2649 }
0x15a6   : > { %4262 = vrcp.f32 %v2650_v53  ;;  %v3469_v53 = vld [vmem:[%s5608_s4 + $0x100] sm:$0xff] }
0x15a9   : > { %v2492_v57 = vpop.permute.xlu0 %2491 }
0x15aa   : > { %3851 = vmatpush3.msra.mxu1 %v2492_v57 }
0x15ab   : > { %3860 = vmatprep.subr.mxu1 %v4346_v6 }
0x15ac   : > { %v4261_v47 = vpop.eup %4260 }
0x15ad   : > { %v2490_v48 = vmul.f32 %v4261_v47, %v4257_v24  ;;  %v3468_v24 = vld [vmem:[%s5608_s4 + $0xf8] sm:$0xff] }
0x15ae   : > { %v3472_v47 = vld [vmem:[%s5608_s4 + $0x118] sm:$0xff] }
0x15af   : > { %3853 = vmatmul.mubr.msk.f32.vlgmr.msra.gmra.mrb[20].mxu1 %vm714_vm4, %v2490_v48  ;;  %v4067_v48 = vpack.c.bf16 %v3472_v47, %v3469_v53  ;;  %v3502_v47 = vld [vmem:[%s5609_s5 + $0x128] sm:$0xff] }
0x15b0   : > { %v4263_v58 = vpop.eup %4262  ;;  %3861 = vmatpush3.msra.mxu1 %v2492_v57  ;;  %3862 = vmatprep.mubr.msk.f32.mxu1 %vm4345_vm3, %v4346_v6  ;;  %v4053_v57 = vpack.c.bf16 %v3470_v18, %v3467_v25  ;;  %v3499_v25 = vld [vmem:[%s5609_s5 + $0x110] sm:$0xff]  ;;  %v3500_v18 = vld [vmem:[%s5609_s5 + $0x118] sm:$0xff] }
0x15b1   : > { %v2652_v56 = vmul.f32 %v4263_v58, %v4259_v51  ;;  %v4051_v51 = vpack.c.bf16 %v3471_v42, %v3468_v24  ;;  %v3474_v58 = vld [vmem:[%s5608_s4 + $0x128] sm:$0xff]  ;;  %v3497_v24 = vld [vmem:[%s5609_s5 + $0x100] sm:$0xff]  ;;  %v4091_v53 = vpack.c.bf16 %v3500_v18, %v3499_v25 }
0x15b2   : > { %v3498_v42 = vld [vmem:[%s5609_s5 + $0x108] sm:$0xff] }
0x15b3   : > { %3863 = vmatmul.mubr.msk.f32.vlgmr.msra.gmra.mrb[22].mxu1 %vm714_vm4, %v2652_v56  ;;  %v3477_v56 = vld [vmem:[%s5608_s4 + $0x140] sm:$0xff] }
0x15b4   : > { %2933 = vmatprep.mubr.f32.mxu1 %v4346_v6  ;;  %v4055_v16 = vpack.c.bf16 %v3477_v56, %v3474_v58  ;;  %v3503_v58 = vld [vmem:[%s5609_s5 + $0x130] sm:$0xff]  ;;  %v3504_v56 = vld [vmem:[%s5609_s5 + $0x138] sm:$0xff] }
0x1682   : > { %v2563_v31 = vpop.f32.mrb[20].mxu1 }
0x1683   : > { %2731 = vrot.lane.b32.xlu1 %v2563_v31, %s4351_s26  ;;  %v3854_v50 = vpop.f32.mrb[21].mxu1  ;;  %v3481_v31 = vld [vmem:[%s5608_s4 + $0x160] sm:$0xff] }
0x1684   : > { %v4061_v50 = vpack.c.bf16 %v3482_v37, %v3479_v30  ;;  %v3511_v30 = vld [vmem:[%s5609_s5 + $0x170] sm:$0xff]  ;;  %v3512_v37 = vld [vmem:[%s5609_s5 + $0x178] sm:$0xff] }
0x1686   : > { %v2722_v32 = vpop.f32.mrb[22].mxu1 }
0x1687   : > { %2735 = vrot.lane.b32.xlu1 %v2722_v32, %s5642_s24  ;;  %v3864_v0 = vpop.f32.mrb[23].mxu1  ;;  %v3484_v32 = vld [vmem:[%s5608_s4 + $0x178] sm:$0xff]  ;;  %s375_s24 = sand.u32 1, %s4332_s18  }
0x1688   : > { %v4073_v0 = vpack.c.bf16 %v3484_v32, %v3481_v31  ;;  %v4109_v31 = vpack.c.bf16 %v3512_v37, %v3511_v30  ;;  %s3400_s26 = sshll.u32 %s375_s24, 4  ;;  %s3323_s30 = scalar_lea.sflag [#allocation3], %s375_s24 }
0x1689   : > { %s377_s22 = scalar_lea.vmem [#allocation2], %s3400_s26  ;;  %s4284_s26 = scalar_lea.vmem %s4283_s25, 512 }
0x168a   : > { %s3337_s15 = sshll.u32 %s377_s22, 4  ;;  %s5559_s15 = int_to_ptr.vmem [resolvable:$true] %s3337_s15 }
0x168b   : > { %p4285_p0 = scmp.lt.s32.totalorder %s5559_s15, %s4283_s25 }
0x16f5   : > { %v2732_v59 = vpop.permute.xlu1 %2731 }
0x16f6   : > { %v2739_v61 = vsel %vm720_vm7, %v2738_v20, %v2732_v59 }
0x16f9   : > { %v2736_v10 = vpop.permute.xlu1 %2735 }
0x16fa   : > { %v2740_v43 = vsel %vm724_vm9, %v2739_v61, %v2736_v10  ;;  %v3460_v10 = vld [vmem:[%s5611_s7 + $0x1] ss:$0 sm:$0xff] }
0x16fb   : > { %3882 = vmatmul.mubr.msk.f32.vlgmr.msra.gmra.mrb[22].mxu0 %vm501_vm2, %v2740_v43 }
0x16fc   : > { %3900 = vmatprep.mubr.msk.f32.mxu0 %vm4345_vm3, %v4346_v6  ;;  %v4047_v6 = vpack.c.bf16 %v3465_v5, %v3462_v3  ;;  %4065 = vmatpush3.bf16.msra.mxu0 %v4064_v17  ;;  %v3492_v5 = vld [vmem:[%s5609_s5 + $0xd8] sm:$0xff] }
0x16fd   : > { %4066 = vmatprep.subr.bf16.mxu0 %v4344_v63 }
0x16fe   : > { %4048 = vmatprep.subr.bf16.mxu1 %v4047_v6 }
0x1700   : > { %4068 = vmatpush3.bf16.msra.mxu0 %v4067_v48 }
0x1701   : > { %4069 = vmatprep.subr.bf16.mxu0 %v4344_v63 }
0x1704   : > { %4071 = vmatpush3.bf16.msra.mxu0 %v4070_v26  ;;  %v3510_v26 = vld [vmem:[%s5609_s5 + $0x168] sm:$0xff] }
0x1705   : > { %4072 = vmatprep.subr.bf16.mxu0 %v4344_v63 }
0x1708   : > { %4074 = vmatpush3.bf16.msra.mxu0 %v4073_v0 }
0x1709   : > { %4113 = vmatprep.subr.msk.bf16.mxu0 %vm5498_vm11, %v4480_v4 }
0x17ce   : > { %v2819_v38 = vpop.f32.mrb[22].mxu0 }
0x17cf   : > { %v5322_v2 = vadd.f32 %v2819_v38, %v5107_v44  ;;  %v3883_v1 = vpop.f32.mrb[23].mxu0  ;;  %v3461_v44 = vld [vmem:[%s5608_s4 + $0xc0] sm:$0xff] }
0x17d0   : > { %v4049_v23 = vpack.c.bf16 %v3464_v11, %v3461_v44  ;;  %v3489_v1 = vld [vmem:[%s5609_s5 + $0xc0] sm:$0xff]  ;;  %v3494_v11 = vld [vmem:[%s5609_s5 + $0xe8] sm:$0xff] }
0x17d1   : > { %v2826_v7 = vmul.f32 %v5322_v2, %v5322_v2  ;;  %v3493_v44 = vld [vmem:[%s5609_s5 + $0xe0] sm:$0xff] }
0x17d2   : > { %4050 = vmatpush1.bf16.msra.mxu1 %v4049_v23  ;;  %v4082_v12 = vpack.c.bf16 %v3494_v11, %v3493_v44  ;;  %v3495_v23 = vld [vmem:[%s5609_s5 + $0xf0] sm:$0xff] }
0x17d3   : > { %v2827_v19 = vsel %vm501_vm2, %v2826_v7, 0.0  ;;  %4052 = vmatprep.subr.bf16.mxu1 %v4051_v51  ;;  %v3490_v7 = vld [vmem:[%s5609_s5 + $0xc8] sm:$0xff]  ;;  %v4085_v17 = vpack.c.bf16 %v3496_v41, %v3495_v23  ;;  %v4088_v51 = vpack.c.bf16 %v3498_v42, %v3497_v24 }
0x17d4   : > { %2828 = vadd.xlane.f32.xlu0 %v2827_v19  ;;  %v3491_v19 = vld [vmem:[%s5609_s5 + $0xd0] sm:$0xff]  ;;  %v4076_v3 = vpack.c.bf16 %v3490_v7, %v3489_v1 }
0x17d5   : > { %v4079_v6 = vpack.c.bf16 %v3492_v5, %v3491_v19 }
0x17d6   : > { %4054 = vmatpush1.bf16.msra.mxu1 %v4053_v57  ;;  %v3501_v57 = vld [vmem:[%s5609_s5 + $0x120] sm:$0xff] }
0x17d7   : > { %4056 = vmatprep.subr.bf16.mxu1 %v4055_v16  ;;  %v4094_v48 = vpack.c.bf16 %v3502_v47, %v3501_v57  ;;  %v4097_v16 = vpack.c.bf16 %v3504_v56, %v3503_v58 }
0x17da   : > { %4058 = vmatpush1.bf16.msra.mxu1 %v4057_v60  ;;  %v3507_v60 = vld [vmem:[%s5609_s5 + $0x150] sm:$0xff] }
0x17db   : > { %4060 = vmatprep.subr.bf16.mxu1 %v4059_v35  ;;  %v4103_v29 = vpack.c.bf16 %v3508_v13, %v3507_v60  ;;  %v4106_v35 = vpack.c.bf16 %v3510_v26, %v3509_v62 }
0x17de   : > { %4062 = vmatpush1.bf16.msra.mxu1 %v4061_v50 }
0x17df   : > { %4075 = vmatprep.subr.bf16.mxu1 %v4344_v63 }
0x1861   : > { %v2829_v36 = vpop.xlane.xlu0 %2828 }
0x1862   : > { %v2830_v59 = vmul.f32 0.015625, %v2829_v36 }
0x1864   : > { %v2831_v20 = vadd.f32 1e-05, %v2830_v59 }
0x1866   : > { %4264 = vrsqrt.f32 %v2831_v20 }
0x1870   : > { %v4265_v61 = vpop.eup %4264 }
0x1871   : > { %v2833_v43 = vmul.f32 %v4265_v61, %v5322_v2 }
0x1873   : > { %v2840_v38 = vmul.f32 %v3460_v10, %v2833_v43 }
0x1875   : > { %3485 = vmatmul.mubr.msk.f32.vlgmr.msra.gmra.mrb[24].mxu1 %vm501_vm2, %v2840_v38  ;;  %3901 = vmatmul.mubr.msk.f32.vlgmr.msra.gmra.mrb[24].mxu0 %vm501_vm2, %v2840_v38 }
0x1876   : > { %4077 = vmatpush1.bf16.msra.mxu1 %v4076_v3  ;;  %4116 = vmatpush3.bf16.xpose.msk.msra.mxu0 %vm5498_vm11, %v4492_v8 }
0x1877   : > { %4078 = vmatprep.subr.bf16.mxu1 %v4344_v63  ;;  %4119 = vmatprep.subr.msk.bf16.mxu0 %vm5498_vm11, %v4494_v9 }
0x187a   : > { %4080 = vmatpush1.bf16.msra.mxu1 %v4079_v6 }
0x187b   : > { %4081 = vmatprep.subr.bf16.mxu1 %v4344_v63 }
0x187e   : > { %4083 = vmatpush1.bf16.msra.mxu1 %v4082_v12  ;;  %4122 = vmatpush3.bf16.xpose.msk.msra.mxu0 %vm5498_vm11, %v4510_v14 }
0x187f   : > { %4084 = vmatprep.subr.bf16.mxu1 %v4344_v63  ;;  %4125 = vmatprep.subr.msk.bf16.mxu0 %vm5498_vm11, %v4516_v15 }
0x1882   : > { %4086 = vmatpush1.bf16.msra.mxu1 %v4085_v17 }
0x1883   : > { %4087 = vmatprep.subr.bf16.mxu1 %v4344_v63 }
0x1886   : > { %4089 = vmatpush1.bf16.msra.mxu1 %v4088_v51  ;;  %4128 = vmatpush3.bf16.xpose.msk.msra.mxu0 %vm5498_vm11, %v4531_v21 }
0x1887   : > { %4090 = vmatprep.subr.bf16.mxu1 %v4344_v63  ;;  %4131 = vmatprep.subr.msk.bf16.mxu0 %vm5498_vm11, %v4534_v22 }
0x188a   : > { %4092 = vmatpush1.bf16.msra.mxu1 %v4091_v53 }
0x188b   : > { %4093 = vmatprep.subr.bf16.mxu1 %v4344_v63 }
0x188e   : > { %4095 = vmatpush1.bf16.msra.mxu1 %v4094_v48  ;;  %4134 = vmatpush3.bf16.xpose.msk.msra.mxu0 %vm5498_vm11, %v4549_v27 }
0x188f   : > { %4096 = vmatprep.subr.bf16.mxu1 %v4344_v63  ;;  %4137 = vmatprep.subr.msk.bf16.mxu0 %vm5498_vm11, %v4552_v28 }
0x1892   : > { %4098 = vmatpush1.bf16.msra.mxu1 %v4097_v16 }
0x1893   : > { %4099 = vmatprep.subr.bf16.mxu1 %v4344_v63 }
0x1896   : > { %4101 = vmatpush1.bf16.msra.mxu1 %v4100_v55  ;;  %4140 = vmatpush3.bf16.xpose.msk.msra.mxu0 %vm5498_vm11, %v4567_v33  ;;  %v3514_v33 = vld [vmem:[%s5612_s8] ss:$0 sm:$0xff] }
0x1897   : > { %4102 = vmatprep.subr.bf16.mxu1 %v4344_v63  ;;  %4143 = vmatprep.subr.msk.bf16.mxu0 %vm5498_vm11, %v4570_v34 }
0x189a   : > { %4104 = vmatpush1.bf16.msra.mxu1 %v4103_v29 }
0x189b   : > { %4105 = vmatprep.subr.bf16.mxu1 %v4344_v63 }
0x189e   : > { %4107 = vmatpush1.bf16.msra.mxu1 %v4106_v35  ;;  %4146 = vmatpush3.bf16.xpose.msk.msra.mxu0 %vm5498_vm11, %v4585_v39 }
0x189f   : > { %4108 = vmatprep.subr.bf16.mxu1 %v4344_v63  ;;  %4149 = vmatprep.subr.msk.bf16.mxu0 %vm5498_vm11, %v4588_v40 }
0x18a2   : > { %4110 = vmatpush1.bf16.msra.mxu1 %v4109_v31 }
0x18a6   : > { %4152 = vmatpush3.bf16.xpose.msk.msra.mxu0 %vm5498_vm11, %v4603_v45 }
0x18a7   : > { %4155 = vmatprep.subr.msk.bf16.mxu0 %vm5498_vm11, %v4606_v46 }
0x18ae   : > { %4158 = vmatpush3.bf16.xpose.msk.msra.mxu0 %vm5498_vm11, %v4615_v49 }
0x1948   : > { %v2935_v50 = vpop.f32.mrb[24].mxu1  ;;  %v3006_v32 = vpop.f32.mrb[24].mxu0 }
0x1949   : > { %v2937_v0 = vpop.f32.mrb[25].mxu1  ;;  %v3902_v36 = vpop.f32.mrb[25].mxu0  ;;  %v3487_v63 = vmul.f32 -1.442695, %v2935_v50 }
0x194a   : > { %3026 = vrot.lane.b32.xlu1 %v2937_v0, %s5634_s29  ;;  %v3488_v59 = vmul.f32 -1.442695, %v2937_v0 }
0x194c   : > { %4266 = vpow2.f32 %v3488_v59 }
0x194d   : > { %4268 = vpow2.f32 %v3487_v63 }
0x194e   : > { %3028 = vrot.lane.b32.xlu1 %v3006_v32, %s5634_s29  ;;  %s4278_s29 = scalar_lea.vmem %s5559_s15, 256 }
0x194f   : > { %p4279_p11 = scmp.ne.s32.totalorder %s5559_s15, %s4278_s29  ;;  %p4286_p1 = scmp.lt.s32.totalorder %s4284_s26, %s4278_s29 }
0x1951   : > { %p4280_p12 = pnand %p4279_p11, %p4460_p5  ;;  %p4287_p2 = por %p4286_p1, %p4285_p0 }
0x1953   : > { %p4281_p13 = pneg %p4280_p12 }
0x1955   : > { %p4288_p3 = pnand %p4287_p2, %p4281_p13 }
0x1956   : > { %v4267_v20 = vpop.eup %4266 }
0x1957   : > { %v4269_v61 = vpop.eup %4268  ;;  %v3017_v10 = vadd.f32 1.0, %v4267_v20 }
0x1958   : > { %v3016_v43 = vadd.f32 1.0, %v4269_v61 }
0x1959   : > { %4270 = vrcp.f32 %v3017_v10 }
0x195a   : > { %4272 = vrcp.f32 %v3016_v43 }
0x1963   : > { %v4271_v38 = vpop.eup %4270 }
0x1964   : > { %v4273_v7 = vpop.eup %4272  ;;  %v3023_v19 = vmul.f32 %v4271_v38, %v2937_v0 }
0x1965   : > { %v3022_v3 = vmul.f32 %v4273_v7, %v2935_v50 }
0x19bc   : > { %v3027_v1 = vpop.permute.xlu1 %3026 }
0x19c0   : > { %v3029_v5 = vpop.permute.xlu1 %3028 }
0x19c1   : > { %v3030_v6 = vsel %vm501_vm2, %v3027_v1, %v3029_v5  ;;  %v3034_v44 = vmul.f32 %v3029_v5, %v3023_v19 }
0x19c2   : > { %v3033_v11 = vmul.f32 %v3030_v6, %v3022_v3 }
0x19c3   : > { %3513 = vmatprep.mubr.msk.f32.mxu1 %vm501_vm2, %v3034_v44 }
0x19c4   : > { %3128 = vmatmul.mubr.f32.vlgmr.msra.gmra.mrb[26].mxu1 %v3033_v11 }
0x1a97   : > { %v3129_v4 = vpop.f32.mrb[26].mxu1 }
0x1a98   : > { %v3133_v8 = vadd.f32 %v3129_v4, %v5322_v2  ;;  %v3131_v9 = vpop.f32.mrb[27].mxu1 }
0x1a9a   : > { %v3135_v14 = vmul.f32 %v3133_v8, %v3133_v8 }
0x1a9c   : > { %v3136_v15 = vsel %vm501_vm2, %v3135_v14, 0.0 }
0x1a9d   : > { %3137 = vadd.xlane.f32.xlu1 %v3136_v15 }
0x1b2a   : > { %v3138_v21 = vpop.xlane.xlu1 %3137 }
0x1b2b   : > { %v3139_v22 = vmul.f32 0.015625, %v3138_v21 }
0x1b2d   : > { %v3140_v27 = vadd.f32 1e-05, %v3139_v22 }
0x1b2f   : > { %4274 = vrsqrt.f32 %v3140_v27 }
0x1b39   : > { %v4275_v28 = vpop.eup %4274 }
0x1b3a   : > { %v3142_v34 = vmul.f32 %v4275_v28, %v3133_v8 }
0x1b3c   : > { %v3149_v39 = vmul.f32 %v3514_v33, %v3142_v34 }
0x1b3e   : > { %3707 = vmatprep.mubr.msk.f32.mxu0 %vm501_vm2, %v3149_v39 }
0x1b3f   : > { %3708 = vmatmul.mubr.msk.f32.vlgmr.msra.gmra.mrb[26].mxu0 %vm501_vm2, %v3149_v39 }
0x1c12   : > { %v3315_v40 = vpop.f32.mrb[26].mxu0 }
0x1c13   : > { %3320 = vst [vmem:[%s377_s22] sm:$0xff] %v3315_v40  ;;  %v3317_v45 = vpop.f32.mrb[27].mxu0 }
0x1c14   : > { %3321 = vst [vmem:[%s377_s22 + $0x8] sm:$0xff] %v3317_v45 }
0x1c15   : > { %4291 = shalt.err (!%p4288_p3)
}
0x1c16   : > { %s4292_s24 = scalar_lea.hbm %s5564_s16, 256  ;;  %s4296_s14 = scalar_lea.hbm %s5615_s11, 512 }
0x1c17   : > { %p4293_p4 = scmp.ne.s32.totalorder %s5564_s16, %s4292_s24  ;;  %p4297_p9 = scmp.lt.u32.totalorder %s5564_s16, %s5615_s11 }
0x1c18   : > { %p4298_p10 = scmp.lt.u32.totalorder %s4296_s14, %s4292_s24  ;;  %p4300_p12 = scmp.lt.u32.totalorder %s4292_s24, %s5564_s16 }
0x1c19   : > { %p4294_p7 = pnand %p4293_p4, %p4460_p5 }
0x1c1a   : > { %p4299_p11 = por %p4298_p10, %p4297_p9 }
0x1c1b   : > { %p4295_p8 = pneg %p4294_p7 }
0x1c1c   : > { %p4301_p13 = por %p4300_p12, %p4299_p11 }
0x1c1e   : > { %p4302_p0 = pnand %p4301_p13, %p4295_p8 }
0x1c20   : > { %4305 = shalt.err (!%p4302_p0)
}
0x1c21   : > { %4159 = dma.vmem_to_hbm [thread:$0]  (%p4460_p5), %s5559_s15, 256, %s5564_s16, %s3323_s30  }
0x1c22 PF: > { %p4165_p1 = scmp.ge.s32.totalorder %s4340_s20, 2  ;;  %s3349_s29 = sand.u32 1, %s4328_s17  }
0x1c23   : > { %s3350_s25 = scalar_lea.sflag [#allocation3], %s3349_s29 }
0x1c24   : > { %p4162_p2 = pnand %p4165_p1, %p4464_p6 }
0x1c26   : > { %4323 = dma.done.wait (!%p4162_p2), %s3350_s25, 256  }
0x1c27   : > { %4325 = vsyncadd (!%p4162_p2), %s3350_s25, 4294967040  ;;  %s5645_s26 = sld [smem:[#allocation5_spill]]  ;;  %p21_p3 = scmp.ge.s32.totalorder %s4447_s23, 4  }
0x1c28   : > { %s5646_s17 = smov %s4332_s18  ;;  %s5647_s18 = smov %s4336_s19 }
0x1c29   : > { %s5649_s20 = smov %s4447_s23  ;;  %23 = sbr.rel (!%p21_p3) target bundleno = 3 (0x3), region = 105 }
0x1c2d   : > { %s5648_s19 = smov %s5645_s26 }
0x1c30   :  { %3355 = vsyncpa [#allocation3], 1 }
0x1c31   :  { %3357 = vsyncpa [#allocation3 + $0x1], 1 }

</bundles_post_ra>
